<compile_context>
chip_gen: v5e
topology: v5e:2x2
jax: 0.10.0
libtpu: 0.0.40
codegen_flags: <defaults>
</compile_context>

<pallas_src>
import jax
import jax.numpy as jnp
from jax.experimental import pallas as pl
from jax.experimental.pallas import tpu as pltpu

NEG_SLOPE = 0.01   # F.leaky_relu negative slope
LN_EPS = 1e-5      # torch.nn.LayerNorm default eps


def _lrelu(x):
    return jnp.where(x >= 0, x, NEG_SLOPE * x)


def _layernorm_over_s(y, ln_w, ln_b):
    # y: (C, S); torch LayerNorm([L,H,W]) on (B,C,L,H,W) -> stats per (b, c),
    # i.e. reduce over S for each channel row.  One-pass sum / sum-of-squares
    # (population variance, eps inside rsqrt — matches torch).
    inv_s = 1.0 / y.shape[1]
    s1 = jnp.sum(y, axis=1, keepdims=True)
    s2 = jnp.sum(y * y, axis=1, keepdims=True)
    mean = s1 * inv_s
    var = s2 * inv_s - mean * mean
    inv = jax.lax.rsqrt(var + LN_EPS)
    return (y - mean) * inv * ln_w + ln_b


def postp_kernel(img_ref, etrue_ref,
                 w1_ref, b1_ref, w2t_ref, b2c_ref, w3_ref, b3_ref,
                 wc1c_ref, wc2at_ref, wc2bt_ref, wc3t_ref, wc4t_ref,
                 wc5t_ref, wc6c_ref, ln_ref,
                 out_ref):
    x = img_ref[0]                       # (1, S)   lane-dense image row
    e_true = etrue_ref[0]                # (1, 1)

    # --- energy-conditioning MLP (econd branch), VPU-only (no 1-row MXU) ---
    total = jnp.sum(x, axis=1, keepdims=True)                       # (1, 1)
    # fcec1: cat([sum, E_true]) @ W1 + b1   (W1 rows indexed by input feature)
    h1 = _lrelu(total * w1_ref[0:1, :] + e_true * w1_ref[1:2, :]
                + b1_ref[...])                                      # (1, ndf2)
    # fcec2: h2[o] = sum_i h1[i] * w2[i, o]  == sum over lanes of w2t[o,:]*h1
    h2 = _lrelu(jnp.sum(w2t_ref[...] * h1, axis=1, keepdims=True)
                + b2c_ref[...])                                     # (ndf2, 1)
    # fcec3: h3[o] = sum_i h2[i] * w3[i, o]  == sum over sublanes of w3*h2
    h3 = _lrelu(jnp.sum(w3_ref[...] * h2, axis=0, keepdims=True)
                + b3_ref[...])                                      # (1, ndf2)
    # conv2 econd contribution (spatially constant): ec[o] = sum_i h3[i]*wc2b[i,o]
    ec = jnp.sum(wc2bt_ref[...] * h3, axis=1, keepdims=True)        # (ndf, 1)

    # --- conv1 (1x1x1, 1 -> ndf): outer product, VPU broadcast-mul ---
    y = wc1c_ref[...] * x                                           # (ndf, S)
    y = _lrelu(_layernorm_over_s(y, ln_ref[0:1, :], ln_ref[1:2, :]))

    # --- conv2 on cat([y, econd]) == wc2a^T @ y + (wc2b^T @ h) ---
    y = jnp.dot(wc2at_ref[...], y, preferred_element_type=jnp.float32) + ec
    y = _lrelu(_layernorm_over_s(y, ln_ref[2:3, :], ln_ref[3:4, :]))

    # --- conv3 / conv4 + LN + leaky ---
    y = jnp.dot(wc3t_ref[...], y, preferred_element_type=jnp.float32)
    y = _lrelu(_layernorm_over_s(y, ln_ref[4:5, :], ln_ref[5:6, :]))
    y = jnp.dot(wc4t_ref[...], y, preferred_element_type=jnp.float32)
    y = _lrelu(_layernorm_over_s(y, ln_ref[6:7, :], ln_ref[7:8, :]))

    # --- conv5 + leaky, conv6 (ndf -> 1, VPU mul + sublane reduce), relu ---
    y = _lrelu(jnp.dot(wc5t_ref[...], y, preferred_element_type=jnp.float32))
    y = jnp.sum(wc6c_ref[...] * y, axis=0, keepdims=True)           # (1, S)
    out_ref[0] = jnp.maximum(y, 0.0)     # out_funct == 'relu'


def postprocess_forward(img, e_true, p, *, layer, isize, ndf):
    S = layer * isize * isize
    ndf2 = ndf // 2
    img5 = img.reshape(-1, 1, layer, isize, isize).astype(jnp.float32)
    B = img5.shape[0]
    x = img5.reshape(B, 1, S)                       # lane-dense: S is last
    et = e_true.reshape(B, 1, 1).astype(jnp.float32)

    # Kernel-form parameters (all transposes/packing done outside the kernel).
    w2t = p['w2'].T                                  # (ndf2, ndf2)
    b2c = p['b2'].reshape(ndf2, 1)                   # (ndf2, 1)
    wc1c = p['wc1'].reshape(ndf, 1)                  # (ndf, 1)
    wc2at = p['wc2a'].T                              # (ndf, ndf)
    wc2bt = p['wc2b'].T                              # (ndf, ndf2)
    wc3t = p['wc3'].T
    wc4t = p['wc4'].T
    wc5t = p['wc5'].T
    wc6c = p['wc6'].reshape(ndf, 1)                  # (ndf, 1)
    ln_all = jnp.stack([p['lnw1'], p['lnb1'], p['lnw2'], p['lnb2'],
                        p['lnw3'], p['lnb3'], p['lnw4'], p['lnb4']],
                       axis=0)                       # (8, S)  lane-dense

    def full(shape):
        return pl.BlockSpec(shape, lambda b, n=len(shape): (0,) * n)

    def per_b(shape):
        return pl.BlockSpec(shape, lambda b, n=len(shape): (b,) + (0,) * (n - 1))

    in_specs = [
        per_b((1, 1, S)), per_b((1, 1, 1)),
        full((2, ndf2)), full((1, ndf2)),
        full((ndf2, ndf2)), full((ndf2, 1)),
        full((ndf2, ndf2)), full((1, ndf2)),
        full((ndf, 1)), full((ndf, ndf)), full((ndf, ndf2)),
        full((ndf, ndf)), full((ndf, ndf)), full((ndf, ndf)), full((ndf, 1)),
        full((8, S)),
    ]

    # Advisory cost model (helps XLA schedule around the custom call).
    flops = int(B * (2 * S * ndf * ndf * 4          # conv2a, conv3, conv4, conv5
                     + 2 * S * ndf * 2              # conv1 + conv6
                     + 2 * ndf * ndf2               # conv2 econd contribution
                     + 3 * 2 * ndf2 * ndf2          # econd MLP
                     + 4 * 8 * S * ndf))            # 4x LayerNorm + leaky relus
    transcendentals = int(B * 4 * ndf)              # rsqrt per channel per LN
    bytes_accessed = int(4 * (2 * B * S + B + 8 * S
                              + 4 * ndf * ndf + ndf * ndf2 + 2 * ndf
                              + 2 * ndf2 * ndf2 + 2 * ndf2 + 4 * ndf2))

    out = pl.pallas_call(
        postp_kernel,
        out_shape=jax.ShapeDtypeStruct((B, 1, S), jnp.float32),
        grid_spec=pltpu.PrefetchScalarGridSpec(
            num_scalar_prefetch=0,
            grid=(B,),
            in_specs=in_specs,
            out_specs=per_b((1, 1, S))),
        compiler_params=pltpu.CompilerParams(
            dimension_semantics=("parallel",),       # batch is independent
            vmem_limit_bytes=64 * 1024 * 1024),
        cost_estimate=pl.CostEstimate(flops=flops,
                                      transcendentals=transcendentals,
                                      bytes_accessed=bytes_accessed),
    )(x, et,
      p['w1'], p['b1'], w2t, b2c, p['w3'], p['b3'],
      wc1c, wc2at, wc2bt, wc3t, wc4t, wc5t, wc6c, ln_all)
    return out.reshape(B, 1, layer, isize, isize)


def init_params(key, *, layer, isize, ndf):
    """Deterministic synthetic parameters with the same shapes as the module."""
    S = layer * isize * isize
    ndf2 = ndf // 2
    keys = jax.random.split(key, 24)
    n = lambda k, shp, s=0.1: s * jax.random.normal(k, shp, dtype=jnp.float32)
    p = {
        'w1': n(keys[0], (2, ndf2)),       'b1': n(keys[1], (1, ndf2)),
        'w2': n(keys[2], (ndf2, ndf2)),    'b2': n(keys[3], (1, ndf2)),
        'w3': n(keys[4], (ndf2, ndf2)),    'b3': n(keys[5], (1, ndf2)),
        'wc1': n(keys[6], (1, ndf)),
        'lnw1': 1.0 + n(keys[7], (S,)),    'lnb1': n(keys[8], (S,)),
        'wc2a': n(keys[9], (ndf, ndf)),    'wc2b': n(keys[10], (ndf2, ndf)),
        'lnw2': 1.0 + n(keys[11], (S,)),   'lnb2': n(keys[12], (S,)),
        'wc3': n(keys[13], (ndf, ndf)),
        'lnw3': 1.0 + n(keys[14], (S,)),   'lnb3': n(keys[15], (S,)),
        'wc4': n(keys[16], (ndf, ndf)),
        'lnw4': 1.0 + n(keys[17], (S,)),   'lnb4': n(keys[18], (S,)),
        'wc5': n(keys[19], (ndf, ndf)),
        'wc6': n(keys[20], (ndf, 1)),
    }
    return p


def reference_forward(img, e_true, p, *, layer, isize, ndf):
    """Pure-JAX replica of the PyTorch forward (NCDHW semantics)."""
    img5 = img.reshape(-1, 1, layer, isize, isize).astype(jnp.float32)
    B = img5.shape[0]
    lrelu = lambda v: jnp.where(v >= 0, v, NEG_SLOPE * v)

    total = jnp.sum(img5.reshape(B, -1), axis=1, keepdims=True)
    econd = jnp.concatenate([total, e_true.reshape(B, 1)], axis=1)
    econd = lrelu(econd @ p['w1'] + p['b1'])
    econd = lrelu(econd @ p['w2'] + p['b2'])
    econd = lrelu(econd @ p['w3'] + p['b3'])

    def conv1x1(x, w):  # x: (B, Cin, L, H, W), w: (Cin, Cout)
        return jnp.einsum('bclhw,cd->bdlhw', x, w)

    def ln(x, w, b):
        w3 = w.reshape(layer, isize, isize)
        b3 = b.reshape(layer, isize, isize)
        mean = jnp.mean(x, axis=(2, 3, 4), keepdims=True)
        var = jnp.mean((x - mean) ** 2, axis=(2, 3, 4), keepdims=True)
        return (x - mean) / jnp.sqrt(var + LN_EPS) * w3 + b3

    y = lrelu(ln(conv1x1(img5, p['wc1']), p['lnw1'], p['lnb1']))
    ec = jnp.broadcast_to(econd[:, :, None, None, None],
                          (B, ndf // 2, layer, isize, isize))
    y = jnp.concatenate([y, ec], axis=1)
    wc2 = jnp.concatenate([p['wc2a'], p['wc2b']], axis=0)
    y = lrelu(ln(conv1x1(y, wc2), p['lnw2'], p['lnb2']))
    y = lrelu(ln(conv1x1(y, p['wc3']), p['lnw3'], p['lnb3']))
    y = lrelu(ln(conv1x1(y, p['wc4']), p['lnw4'], p['lnb4']))
    y = lrelu(conv1x1(y, p['wc5']))
    y = conv1x1(y, p['wc6'])
    return jnp.maximum(y, 0.0).reshape(B, 1, layer, isize, isize)


if __name__ == "__main__":
    # small but consistent shapes: layer=8, isize=4 -> S = 128; ndf=32
    B, LAYER, ISIZE, NDF = 2, 8, 4, 32

    key = jax.random.PRNGKey(0)
    k_img, k_e, k_p = jax.random.split(key, 3)
    img = jax.random.normal(k_img, (B, 1, LAYER, ISIZE, ISIZE), dtype=jnp.float32)
    e_true = jax.random.normal(k_e, (B, 1), dtype=jnp.float32)
    params = init_params(k_p, layer=LAYER, isize=ISIZE, ndf=NDF)

    out = postprocess_forward(img, e_true, params, layer=LAYER, isize=ISIZE, ndf=NDF)
    out = jax.block_until_ready(out)

    ref = reference_forward(img, e_true, params, layer=LAYER, isize=ISIZE, ndf=NDF)
    assert out.shape == (B, 1, LAYER, ISIZE, ISIZE)
    assert jnp.allclose(out, ref, rtol=1e-4, atol=1e-4), "mismatch vs reference"

    print("KERNEL_OK")
</pallas_src>

<mosaic_0001>
module attributes {stable_mosaic.version = 11 : i64} {
  func.func @postp_kernel(%arg0: i32, %arg1: memref<1x1x128xf32, #tpu.memory_space<vmem>>, %arg2: memref<1x1x1xf32, #tpu.memory_space<vmem>>, %arg3: memref<2x16xf32, #tpu.memory_space<vmem>>, %arg4: memref<1x16xf32, #tpu.memory_space<vmem>>, %arg5: memref<16x16xf32, #tpu.memory_space<vmem>>, %arg6: memref<16x1xf32, #tpu.memory_space<vmem>>, %arg7: memref<16x16xf32, #tpu.memory_space<vmem>>, %arg8: memref<1x16xf32, #tpu.memory_space<vmem>>, %arg9: memref<32x1xf32, #tpu.memory_space<vmem>>, %arg10: memref<32x32xf32, #tpu.memory_space<vmem>>, %arg11: memref<32x16xf32, #tpu.memory_space<vmem>>, %arg12: memref<32x32xf32, #tpu.memory_space<vmem>>, %arg13: memref<32x32xf32, #tpu.memory_space<vmem>>, %arg14: memref<32x32xf32, #tpu.memory_space<vmem>>, %arg15: memref<32x1xf32, #tpu.memory_space<vmem>>, %arg16: memref<8x128xf32, #tpu.memory_space<vmem>>, %arg17: memref<1x1x128xf32, #tpu.memory_space<vmem>>) attributes {dimension_semantics = [#tpu.dimension_semantics<parallel>], iteration_bounds = array<i64: 2>, scalar_prefetch = 0 : i64, scratch_operands = 0 : i64, tpu.core_type = #tpu.core_type<tc>, window_params = [{transform_indices = @transform_0, window_bounds = array<i64: 1, 1, 128>}, {transform_indices = @transform_1, window_bounds = array<i64: 1, 1, 1>}, {pipeline_mode = #tpu.pipeline_mode<synchronous>, transform_indices = @transform_2, window_bounds = array<i64: 2, 16>}, {pipeline_mode = #tpu.pipeline_mode<synchronous>, transform_indices = @transform_3, window_bounds = array<i64: 1, 16>}, {pipeline_mode = #tpu.pipeline_mode<synchronous>, transform_indices = @transform_4, window_bounds = array<i64: 16, 16>}, {pipeline_mode = #tpu.pipeline_mode<synchronous>, transform_indices = @transform_5, window_bounds = array<i64: 16, 1>}, {pipeline_mode = #tpu.pipeline_mode<synchronous>, transform_indices = @transform_6, window_bounds = array<i64: 16, 16>}, {pipeline_mode = #tpu.pipeline_mode<synchronous>, transform_indices = @transform_7, window_bounds = array<i64: 1, 16>}, {pipeline_mode = #tpu.pipeline_mode<synchronous>, transform_indices = @transform_8, window_bounds = array<i64: 32, 1>}, {pipeline_mode = #tpu.pipeline_mode<synchronous>, transform_indices = @transform_9, window_bounds = array<i64: 32, 32>}, {pipeline_mode = #tpu.pipeline_mode<synchronous>, transform_indices = @transform_10, window_bounds = array<i64: 32, 16>}, {pipeline_mode = #tpu.pipeline_mode<synchronous>, transform_indices = @transform_11, window_bounds = array<i64: 32, 32>}, {pipeline_mode = #tpu.pipeline_mode<synchronous>, transform_indices = @transform_12, window_bounds = array<i64: 32, 32>}, {pipeline_mode = #tpu.pipeline_mode<synchronous>, transform_indices = @transform_13, window_bounds = array<i64: 32, 32>}, {pipeline_mode = #tpu.pipeline_mode<synchronous>, transform_indices = @transform_14, window_bounds = array<i64: 32, 1>}, {pipeline_mode = #tpu.pipeline_mode<synchronous>, transform_indices = @transform_15, window_bounds = array<i64: 8, 128>}, {transform_indices = @transform_16, window_bounds = array<i64: 1, 1, 128>}]} {
    %c0 = arith.constant 0 : index
    %c0_0 = arith.constant 0 : index
    %c0_1 = arith.constant 0 : index
    %0 = vector.load %arg1[%c0, %c0_0, %c0_1] : memref<1x1x128xf32, #tpu.memory_space<vmem>>, vector<1x1x128xf32>
    %1 = vector.shape_cast %0 : vector<1x1x128xf32> to vector<1x128xf32>
    %c0_2 = arith.constant 0 : index
    %c0_3 = arith.constant 0 : index
    %c0_4 = arith.constant 0 : index
    %2 = vector.load %arg2[%c0_2, %c0_3, %c0_4] : memref<1x1x1xf32, #tpu.memory_space<vmem>>, vector<1x1x1xf32>
    %3 = vector.shape_cast %2 : vector<1x1x1xf32> to vector<1x1xf32>
    %cst = arith.constant dense<0.000000e+00> : vector<1xf32>
    %4 = vector.multi_reduction <add>, %1, %cst [1] : vector<1x128xf32> to vector<1xf32>
    %5 = vector.shape_cast %4 : vector<1xf32> to vector<1x1xf32>
    %c0_5 = arith.constant 0 : index
    %c0_6 = arith.constant 0 : index
    %6 = vector.load %arg3[%c0_5, %c0_6] : memref<2x16xf32, #tpu.memory_space<vmem>>, vector<1x16xf32>
    %7 = vector.broadcast %5 : vector<1x1xf32> to vector<1x16xf32>
    %8 = arith.mulf %7, %6 : vector<1x16xf32>
    %c1 = arith.constant 1 : index
    %c0_7 = arith.constant 0 : index
    %9 = vector.load %arg3[%c1, %c0_7] : memref<2x16xf32, #tpu.memory_space<vmem>>, vector<1x16xf32>
    %10 = vector.broadcast %3 : vector<1x1xf32> to vector<1x16xf32>
    %11 = arith.mulf %10, %9 : vector<1x16xf32>
    %12 = arith.addf %8, %11 : vector<1x16xf32>
    %c0_8 = arith.constant 0 : index
    %c0_9 = arith.constant 0 : index
    %13 = vector.load %arg4[%c0_8, %c0_9] : memref<1x16xf32, #tpu.memory_space<vmem>>, vector<1x16xf32>
    %14 = arith.addf %12, %13 : vector<1x16xf32>
    %cst_10 = arith.constant 0.000000e+00 : f32
    %15 = vector.broadcast %cst_10 : f32 to vector<1x16xf32>
    %16 = arith.cmpf oge, %14, %15 : vector<1x16xf32>
    %cst_11 = arith.constant 0.00999999977 : f32
    %17 = vector.broadcast %cst_11 : f32 to vector<1x16xf32>
    %18 = arith.mulf %17, %14 : vector<1x16xf32>
    %19 = arith.select %16, %14, %18 : vector<1x16xi1>, vector<1x16xf32>
    %c0_12 = arith.constant 0 : index
    %c0_13 = arith.constant 0 : index
    %20 = vector.load %arg5[%c0_12, %c0_13] : memref<16x16xf32, #tpu.memory_space<vmem>>, vector<16x16xf32>
    %21 = vector.broadcast %19 : vector<1x16xf32> to vector<16x16xf32>
    %22 = arith.mulf %20, %21 : vector<16x16xf32>
    %cst_14 = arith.constant dense<0.000000e+00> : vector<16xf32>
    %23 = vector.multi_reduction <add>, %22, %cst_14 [1] : vector<16x16xf32> to vector<16xf32>
    %24 = vector.shape_cast %23 : vector<16xf32> to vector<16x1xf32>
    %c0_15 = arith.constant 0 : index
    %c0_16 = arith.constant 0 : index
    %25 = vector.load %arg6[%c0_15, %c0_16] : memref<16x1xf32, #tpu.memory_space<vmem>>, vector<16x1xf32>
    %26 = arith.addf %24, %25 : vector<16x1xf32>
    %cst_17 = arith.constant 0.000000e+00 : f32
    %27 = vector.broadcast %cst_17 : f32 to vector<16x1xf32>
    %28 = arith.cmpf oge, %26, %27 : vector<16x1xf32>
    %cst_18 = arith.constant 0.00999999977 : f32
    %29 = vector.broadcast %cst_18 : f32 to vector<16x1xf32>
    %30 = arith.mulf %29, %26 : vector<16x1xf32>
    %31 = arith.select %28, %26, %30 : vector<16x1xi1>, vector<16x1xf32>
    %c0_19 = arith.constant 0 : index
    %c0_20 = arith.constant 0 : index
    %32 = vector.load %arg7[%c0_19, %c0_20] : memref<16x16xf32, #tpu.memory_space<vmem>>, vector<16x16xf32>
    %33 = vector.broadcast %31 : vector<16x1xf32> to vector<16x16xf32>
    %34 = arith.mulf %32, %33 : vector<16x16xf32>
    %cst_21 = arith.constant dense<0.000000e+00> : vector<16xf32>
    %35 = vector.multi_reduction <add>, %34, %cst_21 [0] : vector<16x16xf32> to vector<16xf32>
    %36 = vector.shape_cast %35 : vector<16xf32> to vector<1x16xf32>
    %c0_22 = arith.constant 0 : index
    %c0_23 = arith.constant 0 : index
    %37 = vector.load %arg8[%c0_22, %c0_23] : memref<1x16xf32, #tpu.memory_space<vmem>>, vector<1x16xf32>
    %38 = arith.addf %36, %37 : vector<1x16xf32>
    %cst_24 = arith.constant 0.000000e+00 : f32
    %39 = vector.broadcast %cst_24 : f32 to vector<1x16xf32>
    %40 = arith.cmpf oge, %38, %39 : vector<1x16xf32>
    %cst_25 = arith.constant 0.00999999977 : f32
    %41 = vector.broadcast %cst_25 : f32 to vector<1x16xf32>
    %42 = arith.mulf %41, %38 : vector<1x16xf32>
    %43 = arith.select %40, %38, %42 : vector<1x16xi1>, vector<1x16xf32>
    %c0_26 = arith.constant 0 : index
    %c0_27 = arith.constant 0 : index
    %44 = vector.load %arg11[%c0_26, %c0_27] : memref<32x16xf32, #tpu.memory_space<vmem>>, vector<32x16xf32>
    %45 = vector.broadcast %43 : vector<1x16xf32> to vector<32x16xf32>
    %46 = arith.mulf %44, %45 : vector<32x16xf32>
    %cst_28 = arith.constant dense<0.000000e+00> : vector<32xf32>
    %47 = vector.multi_reduction <add>, %46, %cst_28 [1] : vector<32x16xf32> to vector<32xf32>
    %48 = vector.shape_cast %47 : vector<32xf32> to vector<32x1xf32>
    %c0_29 = arith.constant 0 : index
    %c0_30 = arith.constant 0 : index
    %49 = vector.load %arg9[%c0_29, %c0_30] : memref<32x1xf32, #tpu.memory_space<vmem>>, vector<32x1xf32>
    %50 = vector.broadcast %49 : vector<32x1xf32> to vector<32x128xf32>
    %51 = vector.broadcast %1 : vector<1x128xf32> to vector<32x128xf32>
    %52 = arith.mulf %50, %51 : vector<32x128xf32>
    %c0_31 = arith.constant 0 : index
    %c0_32 = arith.constant 0 : index
    %53 = vector.load %arg16[%c0_31, %c0_32] : memref<8x128xf32, #tpu.memory_space<vmem>>, vector<1x128xf32>
    %c1_33 = arith.constant 1 : index
    %c0_34 = arith.constant 0 : index
    %54 = vector.load %arg16[%c1_33, %c0_34] : memref<8x128xf32, #tpu.memory_space<vmem>>, vector<1x128xf32>
    %cst_35 = arith.constant dense<0.000000e+00> : vector<32xf32>
    %55 = vector.multi_reduction <add>, %52, %cst_35 [1] : vector<32x128xf32> to vector<32xf32>
    %56 = vector.shape_cast %55 : vector<32xf32> to vector<32x1xf32>
    %57 = arith.mulf %52, %52 : vector<32x128xf32>
    %cst_36 = arith.constant dense<0.000000e+00> : vector<32xf32>
    %58 = vector.multi_reduction <add>, %57, %cst_36 [1] : vector<32x128xf32> to vector<32xf32>
    %59 = vector.shape_cast %58 : vector<32xf32> to vector<32x1xf32>
    %cst_37 = arith.constant 7.812500e-03 : f32
    %60 = vector.broadcast %cst_37 : f32 to vector<32x1xf32>
    %61 = arith.mulf %56, %60 : vector<32x1xf32>
    %cst_38 = arith.constant 7.812500e-03 : f32
    %62 = vector.broadcast %cst_38 : f32 to vector<32x1xf32>
    %63 = arith.mulf %59, %62 : vector<32x1xf32>
    %64 = arith.mulf %61, %61 : vector<32x1xf32>
    %65 = arith.subf %63, %64 : vector<32x1xf32>
    %cst_39 = arith.constant 9.99999974E-6 : f32
    %66 = vector.broadcast %cst_39 : f32 to vector<32x1xf32>
    %67 = arith.addf %65, %66 : vector<32x1xf32>
    %68 = math.rsqrt %67 : vector<32x1xf32>
    %69 = vector.broadcast %61 : vector<32x1xf32> to vector<32x128xf32>
    %70 = arith.subf %52, %69 : vector<32x128xf32>
    %71 = vector.broadcast %68 : vector<32x1xf32> to vector<32x128xf32>
    %72 = arith.mulf %70, %71 : vector<32x128xf32>
    %73 = vector.broadcast %53 : vector<1x128xf32> to vector<32x128xf32>
    %74 = arith.mulf %72, %73 : vector<32x128xf32>
    %75 = vector.broadcast %54 : vector<1x128xf32> to vector<32x128xf32>
    %76 = arith.addf %74, %75 : vector<32x128xf32>
    %cst_40 = arith.constant 0.000000e+00 : f32
    %77 = vector.broadcast %cst_40 : f32 to vector<32x128xf32>
    %78 = arith.cmpf oge, %76, %77 : vector<32x128xf32>
    %cst_41 = arith.constant 0.00999999977 : f32
    %79 = vector.broadcast %cst_41 : f32 to vector<32x128xf32>
    %80 = arith.mulf %79, %76 : vector<32x128xf32>
    %81 = arith.select %78, %76, %80 : vector<32x128xi1>, vector<32x128xf32>
    %c0_42 = arith.constant 0 : index
    %c0_43 = arith.constant 0 : index
    %82 = vector.load %arg10[%c0_42, %c0_43] : memref<32x32xf32, #tpu.memory_space<vmem>>, vector<32x32xf32>
    %cst_44 = arith.constant dense<0.000000e+00> : vector<32x128xf32>
    %83 = tpu.matmul %82, %81, %cst_44 {dimension_numbers = #tpu.dot_dimension_numbers<[1], [0], [0], [1], [0, 0, 1, 1], [], []>} : vector<32x32xf32>, vector<32x128xf32>, vector<32x128xf32> -> vector<32x128xf32>
    %84 = vector.broadcast %48 : vector<32x1xf32> to vector<32x128xf32>
    %85 = arith.addf %83, %84 : vector<32x128xf32>
    %c2 = arith.constant 2 : index
    %c0_45 = arith.constant 0 : index
    %86 = vector.load %arg16[%c2, %c0_45] : memref<8x128xf32, #tpu.memory_space<vmem>>, vector<1x128xf32>
    %c3 = arith.constant 3 : index
    %c0_46 = arith.constant 0 : index
    %87 = vector.load %arg16[%c3, %c0_46] : memref<8x128xf32, #tpu.memory_space<vmem>>, vector<1x128xf32>
    %cst_47 = arith.constant dense<0.000000e+00> : vector<32xf32>
    %88 = vector.multi_reduction <add>, %85, %cst_47 [1] : vector<32x128xf32> to vector<32xf32>
    %89 = vector.shape_cast %88 : vector<32xf32> to vector<32x1xf32>
    %90 = arith.mulf %85, %85 : vector<32x128xf32>
    %cst_48 = arith.constant dense<0.000000e+00> : vector<32xf32>
    %91 = vector.multi_reduction <add>, %90, %cst_48 [1] : vector<32x128xf32> to vector<32xf32>
    %92 = vector.shape_cast %91 : vector<32xf32> to vector<32x1xf32>
    %cst_49 = arith.constant 7.812500e-03 : f32
    %93 = vector.broadcast %cst_49 : f32 to vector<32x1xf32>
    %94 = arith.mulf %89, %93 : vector<32x1xf32>
    %cst_50 = arith.constant 7.812500e-03 : f32
    %95 = vector.broadcast %cst_50 : f32 to vector<32x1xf32>
    %96 = arith.mulf %92, %95 : vector<32x1xf32>
    %97 = arith.mulf %94, %94 : vector<32x1xf32>
    %98 = arith.subf %96, %97 : vector<32x1xf32>
    %cst_51 = arith.constant 9.99999974E-6 : f32
    %99 = vector.broadcast %cst_51 : f32 to vector<32x1xf32>
    %100 = arith.addf %98, %99 : vector<32x1xf32>
    %101 = math.rsqrt %100 : vector<32x1xf32>
    %102 = vector.broadcast %94 : vector<32x1xf32> to vector<32x128xf32>
    %103 = arith.subf %85, %102 : vector<32x128xf32>
    %104 = vector.broadcast %101 : vector<32x1xf32> to vector<32x128xf32>
    %105 = arith.mulf %103, %104 : vector<32x128xf32>
    %106 = vector.broadcast %86 : vector<1x128xf32> to vector<32x128xf32>
    %107 = arith.mulf %105, %106 : vector<32x128xf32>
    %108 = vector.broadcast %87 : vector<1x128xf32> to vector<32x128xf32>
    %109 = arith.addf %107, %108 : vector<32x128xf32>
    %cst_52 = arith.constant 0.000000e+00 : f32
    %110 = vector.broadcast %cst_52 : f32 to vector<32x128xf32>
    %111 = arith.cmpf oge, %109, %110 : vector<32x128xf32>
    %cst_53 = arith.constant 0.00999999977 : f32
    %112 = vector.broadcast %cst_53 : f32 to vector<32x128xf32>
    %113 = arith.mulf %112, %109 : vector<32x128xf32>
    %114 = arith.select %111, %109, %113 : vector<32x128xi1>, vector<32x128xf32>
    %c0_54 = arith.constant 0 : index
    %c0_55 = arith.constant 0 : index
    %115 = vector.load %arg12[%c0_54, %c0_55] : memref<32x32xf32, #tpu.memory_space<vmem>>, vector<32x32xf32>
    %cst_56 = arith.constant dense<0.000000e+00> : vector<32x128xf32>
    %116 = tpu.matmul %115, %114, %cst_56 {dimension_numbers = #tpu.dot_dimension_numbers<[1], [0], [0], [1], [0, 0, 1, 1], [], []>} : vector<32x32xf32>, vector<32x128xf32>, vector<32x128xf32> -> vector<32x128xf32>
    %c4 = arith.constant 4 : index
    %c0_57 = arith.constant 0 : index
    %117 = vector.load %arg16[%c4, %c0_57] : memref<8x128xf32, #tpu.memory_space<vmem>>, vector<1x128xf32>
    %c5 = arith.constant 5 : index
    %c0_58 = arith.constant 0 : index
    %118 = vector.load %arg16[%c5, %c0_58] : memref<8x128xf32, #tpu.memory_space<vmem>>, vector<1x128xf32>
    %cst_59 = arith.constant dense<0.000000e+00> : vector<32xf32>
    %119 = vector.multi_reduction <add>, %116, %cst_59 [1] : vector<32x128xf32> to vector<32xf32>
    %120 = vector.shape_cast %119 : vector<32xf32> to vector<32x1xf32>
    %121 = arith.mulf %116, %116 : vector<32x128xf32>
    %cst_60 = arith.constant dense<0.000000e+00> : vector<32xf32>
    %122 = vector.multi_reduction <add>, %121, %cst_60 [1] : vector<32x128xf32> to vector<32xf32>
    %123 = vector.shape_cast %122 : vector<32xf32> to vector<32x1xf32>
    %cst_61 = arith.constant 7.812500e-03 : f32
    %124 = vector.broadcast %cst_61 : f32 to vector<32x1xf32>
    %125 = arith.mulf %120, %124 : vector<32x1xf32>
    %cst_62 = arith.constant 7.812500e-03 : f32
    %126 = vector.broadcast %cst_62 : f32 to vector<32x1xf32>
    %127 = arith.mulf %123, %126 : vector<32x1xf32>
    %128 = arith.mulf %125, %125 : vector<32x1xf32>
    %129 = arith.subf %127, %128 : vector<32x1xf32>
    %cst_63 = arith.constant 9.99999974E-6 : f32
    %130 = vector.broadcast %cst_63 : f32 to vector<32x1xf32>
    %131 = arith.addf %129, %130 : vector<32x1xf32>
    %132 = math.rsqrt %131 : vector<32x1xf32>
    %133 = vector.broadcast %125 : vector<32x1xf32> to vector<32x128xf32>
    %134 = arith.subf %116, %133 : vector<32x128xf32>
    %135 = vector.broadcast %132 : vector<32x1xf32> to vector<32x128xf32>
    %136 = arith.mulf %134, %135 : vector<32x128xf32>
    %137 = vector.broadcast %117 : vector<1x128xf32> to vector<32x128xf32>
    %138 = arith.mulf %136, %137 : vector<32x128xf32>
    %139 = vector.broadcast %118 : vector<1x128xf32> to vector<32x128xf32>
    %140 = arith.addf %138, %139 : vector<32x128xf32>
    %cst_64 = arith.constant 0.000000e+00 : f32
    %141 = vector.broadcast %cst_64 : f32 to vector<32x128xf32>
    %142 = arith.cmpf oge, %140, %141 : vector<32x128xf32>
    %cst_65 = arith.constant 0.00999999977 : f32
    %143 = vector.broadcast %cst_65 : f32 to vector<32x128xf32>
    %144 = arith.mulf %143, %140 : vector<32x128xf32>
    %145 = arith.select %142, %140, %144 : vector<32x128xi1>, vector<32x128xf32>
    %c0_66 = arith.constant 0 : index
    %c0_67 = arith.constant 0 : index
    %146 = vector.load %arg13[%c0_66, %c0_67] : memref<32x32xf32, #tpu.memory_space<vmem>>, vector<32x32xf32>
    %cst_68 = arith.constant dense<0.000000e+00> : vector<32x128xf32>
    %147 = tpu.matmul %146, %145, %cst_68 {dimension_numbers = #tpu.dot_dimension_numbers<[1], [0], [0], [1], [0, 0, 1, 1], [], []>} : vector<32x32xf32>, vector<32x128xf32>, vector<32x128xf32> -> vector<32x128xf32>
    %c6 = arith.constant 6 : index
    %c0_69 = arith.constant 0 : index
    %148 = vector.load %arg16[%c6, %c0_69] : memref<8x128xf32, #tpu.memory_space<vmem>>, vector<1x128xf32>
    %c7 = arith.constant 7 : index
    %c0_70 = arith.constant 0 : index
    %149 = vector.load %arg16[%c7, %c0_70] : memref<8x128xf32, #tpu.memory_space<vmem>>, vector<1x128xf32>
    %cst_71 = arith.constant dense<0.000000e+00> : vector<32xf32>
    %150 = vector.multi_reduction <add>, %147, %cst_71 [1] : vector<32x128xf32> to vector<32xf32>
    %151 = vector.shape_cast %150 : vector<32xf32> to vector<32x1xf32>
    %152 = arith.mulf %147, %147 : vector<32x128xf32>
    %cst_72 = arith.constant dense<0.000000e+00> : vector<32xf32>
    %153 = vector.multi_reduction <add>, %152, %cst_72 [1] : vector<32x128xf32> to vector<32xf32>
    %154 = vector.shape_cast %153 : vector<32xf32> to vector<32x1xf32>
    %cst_73 = arith.constant 7.812500e-03 : f32
    %155 = vector.broadcast %cst_73 : f32 to vector<32x1xf32>
    %156 = arith.mulf %151, %155 : vector<32x1xf32>
    %cst_74 = arith.constant 7.812500e-03 : f32
    %157 = vector.broadcast %cst_74 : f32 to vector<32x1xf32>
    %158 = arith.mulf %154, %157 : vector<32x1xf32>
    %159 = arith.mulf %156, %156 : vector<32x1xf32>
    %160 = arith.subf %158, %159 : vector<32x1xf32>
    %cst_75 = arith.constant 9.99999974E-6 : f32
    %161 = vector.broadcast %cst_75 : f32 to vector<32x1xf32>
    %162 = arith.addf %160, %161 : vector<32x1xf32>
    %163 = math.rsqrt %162 : vector<32x1xf32>
    %164 = vector.broadcast %156 : vector<32x1xf32> to vector<32x128xf32>
    %165 = arith.subf %147, %164 : vector<32x128xf32>
    %166 = vector.broadcast %163 : vector<32x1xf32> to vector<32x128xf32>
    %167 = arith.mulf %165, %166 : vector<32x128xf32>
    %168 = vector.broadcast %148 : vector<1x128xf32> to vector<32x128xf32>
    %169 = arith.mulf %167, %168 : vector<32x128xf32>
    %170 = vector.broadcast %149 : vector<1x128xf32> to vector<32x128xf32>
    %171 = arith.addf %169, %170 : vector<32x128xf32>
    %cst_76 = arith.constant 0.000000e+00 : f32
    %172 = vector.broadcast %cst_76 : f32 to vector<32x128xf32>
    %173 = arith.cmpf oge, %171, %172 : vector<32x128xf32>
    %cst_77 = arith.constant 0.00999999977 : f32
    %174 = vector.broadcast %cst_77 : f32 to vector<32x128xf32>
    %175 = arith.mulf %174, %171 : vector<32x128xf32>
    %176 = arith.select %173, %171, %175 : vector<32x128xi1>, vector<32x128xf32>
    %c0_78 = arith.constant 0 : index
    %c0_79 = arith.constant 0 : index
    %177 = vector.load %arg14[%c0_78, %c0_79] : memref<32x32xf32, #tpu.memory_space<vmem>>, vector<32x32xf32>
    %cst_80 = arith.constant dense<0.000000e+00> : vector<32x128xf32>
    %178 = tpu.matmul %177, %176, %cst_80 {dimension_numbers = #tpu.dot_dimension_numbers<[1], [0], [0], [1], [0, 0, 1, 1], [], []>} : vector<32x32xf32>, vector<32x128xf32>, vector<32x128xf32> -> vector<32x128xf32>
    %cst_81 = arith.constant 0.000000e+00 : f32
    %179 = vector.broadcast %cst_81 : f32 to vector<32x128xf32>
    %180 = arith.cmpf oge, %178, %179 : vector<32x128xf32>
    %cst_82 = arith.constant 0.00999999977 : f32
    %181 = vector.broadcast %cst_82 : f32 to vector<32x128xf32>
    %182 = arith.mulf %181, %178 : vector<32x128xf32>
    %183 = arith.select %180, %178, %182 : vector<32x128xi1>, vector<32x128xf32>
    %c0_83 = arith.constant 0 : index
    %c0_84 = arith.constant 0 : index
    %184 = vector.load %arg15[%c0_83, %c0_84] : memref<32x1xf32, #tpu.memory_space<vmem>>, vector<32x1xf32>
    %185 = vector.broadcast %184 : vector<32x1xf32> to vector<32x128xf32>
    %186 = arith.mulf %185, %183 : vector<32x128xf32>
    %cst_85 = arith.constant dense<0.000000e+00> : vector<128xf32>
    %187 = vector.multi_reduction <add>, %186, %cst_85 [0] : vector<32x128xf32> to vector<128xf32>
    %188 = vector.shape_cast %187 : vector<128xf32> to vector<1x128xf32>
    %cst_86 = arith.constant 0.000000e+00 : f32
    %189 = vector.broadcast %cst_86 : f32 to vector<1x128xf32>
    %190 = arith.maximumf %188, %189 : vector<1x128xf32>
    %c0_87 = arith.constant 0 : index
    %c0_88 = arith.constant 0 : index
    %c0_89 = arith.constant 0 : index
    %191 = vector.load %arg17[%c0_87, %c0_88, %c0_89] : memref<1x1x128xf32, #tpu.memory_space<vmem>>, vector<1x1x128xf32>
    %192 = vector.shape_cast %191 : vector<1x1x128xf32> to vector<1x128xf32>
    %193 = vector.shape_cast %190 : vector<1x128xf32> to vector<1x1x128xf32>
    tpu.vector_store %arg17[%c0_87, %c0_88, %c0_89], %193 {strides = array<i32>} : memref<1x1x128xf32, #tpu.memory_space<vmem>>, vector<1x1x128xf32>,
    return
  }
  func.func @transform_0(%arg0: i32) -> (i32, i32, i32) {
    %c0_i32 = arith.constant 0 : i32
    %c0_i32_0 = arith.constant 0 : i32
    %c0_i32_1 = arith.constant 0 : i32
    return %arg0, %c0_i32, %c0_i32_0 : i32, i32, i32
  }
  func.func @transform_1(%arg0: i32) -> (i32, i32, i32) {
    %c0_i32 = arith.constant 0 : i32
    %c0_i32_0 = arith.constant 0 : i32
    %c0_i32_1 = arith.constant 0 : i32
    return %arg0, %c0_i32, %c0_i32_0 : i32, i32, i32
  }
  func.func @transform_2(%arg0: i32) -> (i32, i32) {
    %c0_i32 = arith.constant 0 : i32
    %c0_i32_0 = arith.constant 0 : i32
    %c0_i32_1 = arith.constant 0 : i32
    return %c0_i32, %c0_i32_0 : i32, i32
  }
  func.func @transform_3(%arg0: i32) -> (i32, i32) {
    %c0_i32 = arith.constant 0 : i32
    %c0_i32_0 = arith.constant 0 : i32
    %c0_i32_1 = arith.constant 0 : i32
    return %c0_i32, %c0_i32_0 : i32, i32
  }
  func.func @transform_4(%arg0: i32) -> (i32, i32) {
    %c0_i32 = arith.constant 0 : i32
    %c0_i32_0 = arith.constant 0 : i32
    %c0_i32_1 = arith.constant 0 : i32
    return %c0_i32, %c0_i32_0 : i32, i32
  }
  func.func @transform_5(%arg0: i32) -> (i32, i32) {
    %c0_i32 = arith.constant 0 : i32
    %c0_i32_0 = arith.constant 0 : i32
    %c0_i32_1 = arith.constant 0 : i32
    return %c0_i32, %c0_i32_0 : i32, i32
  }
  func.func @transform_6(%arg0: i32) -> (i32, i32) {
    %c0_i32 = arith.constant 0 : i32
    %c0_i32_0 = arith.constant 0 : i32
    %c0_i32_1 = arith.constant 0 : i32
    return %c0_i32, %c0_i32_0 : i32, i32
  }
  func.func @transform_7(%arg0: i32) -> (i32, i32) {
    %c0_i32 = arith.constant 0 : i32
    %c0_i32_0 = arith.constant 0 : i32
    %c0_i32_1 = arith.constant 0 : i32
    return %c0_i32, %c0_i32_0 : i32, i32
  }
  func.func @transform_8(%arg0: i32) -> (i32, i32) {
    %c0_i32 = arith.constant 0 : i32
    %c0_i32_0 = arith.constant 0 : i32
    %c0_i32_1 = arith.constant 0 : i32
    return %c0_i32, %c0_i32_0 : i32, i32
  }
  func.func @transform_9(%arg0: i32) -> (i32, i32) {
    %c0_i32 = arith.constant 0 : i32
    %c0_i32_0 = arith.constant 0 : i32
    %c0_i32_1 = arith.constant 0 : i32
    return %c0_i32, %c0_i32_0 : i32, i32
  }
  func.func @transform_10(%arg0: i32) -> (i32, i32) {
    %c0_i32 = arith.constant 0 : i32
    %c0_i32_0 = arith.constant 0 : i32
    %c0_i32_1 = arith.constant 0 : i32
    return %c0_i32, %c0_i32_0 : i32, i32
  }
  func.func @transform_11(%arg0: i32) -> (i32, i32) {
    %c0_i32 = arith.constant 0 : i32
    %c0_i32_0 = arith.constant 0 : i32
    %c0_i32_1 = arith.constant 0 : i32
    return %c0_i32, %c0_i32_0 : i32, i32
  }
  func.func @transform_12(%arg0: i32) -> (i32, i32) {
    %c0_i32 = arith.constant 0 : i32
    %c0_i32_0 = arith.constant 0 : i32
    %c0_i32_1 = arith.constant 0 : i32
    return %c0_i32, %c0_i32_0 : i32, i32
  }
  func.func @transform_13(%arg0: i32) -> (i32, i32) {
    %c0_i32 = arith.constant 0 : i32
    %c0_i32_0 = arith.constant 0 : i32
    %c0_i32_1 = arith.constant 0 : i32
    return %c0_i32, %c0_i32_0 : i32, i32
  }
  func.func @transform_14(%arg0: i32) -> (i32, i32) {
    %c0_i32 = arith.constant 0 : i32
    %c0_i32_0 = arith.constant 0 : i32
    %c0_i32_1 = arith.constant 0 : i32
    return %c0_i32, %c0_i32_0 : i32, i32
  }
  func.func @transform_15(%arg0: i32) -> (i32, i32) {
    %c0_i32 = arith.constant 0 : i32
    %c0_i32_0 = arith.constant 0 : i32
    %c0_i32_1 = arith.constant 0 : i32
    return %c0_i32, %c0_i32_0 : i32, i32
  }
  func.func @transform_16(%arg0: i32) -> (i32, i32, i32) {
    %c0_i32 = arith.constant 0 : i32
    %c0_i32_0 = arith.constant 0 : i32
    %c0_i32_1 = arith.constant 0 : i32
    return %arg0, %c0_i32, %c0_i32_0 : i32, i32, i32
  }
}

</mosaic_0001>

<bundles_post_ra>
// kernel: tpu_custom_call.1
= control target key start
LH: loop header
LB: loop body
LE: loop exit
PB: predicated region body
PF: predicated region fallthrough
CT: control target
= control target key end

     0   :  { %s2469_s0 = inlined_call_operand.hbm [shape: f32[2,1,128], index: 0, kind: input, shape index: {}]   ;;  %s2470_s1 = inlined_call_operand.vmem [shape: f32[2,1,1], index: 1, kind: input, shape index: {}]   ;;  %s2471_s2 = inlined_call_operand.hbm [shape: f32[2,16], index: 2, kind: input, shape index: {}]   ;;  %s2472_s3 = inlined_call_operand.hbm [shape: f32[1,16], index: 3, kind: input, shape index: {}]   ;;  %s2473_s4 = inlined_call_operand.hbm [shape: f32[16,16], index: 4, kind: input, shape index: {}]   ;;  %s2474_s5 = inlined_call_operand.vmem [shape: f32[16,1], index: 5, kind: input, shape index: {}]   ;;  %s2475_s6 = inlined_call_operand.hbm [shape: f32[16,16], index: 6, kind: input, shape index: {}]   ;;  %s2476_s7 = inlined_call_operand.vmem [shape: f32[1,16], index: 7, kind: input, shape index: {}]   ;;  %s2477_s8 = inlined_call_operand.vmem [shape: f32[32,1], index: 8, kind: input, shape index: {}]   ;;  %s2478_s9 = inlined_call_operand.vmem [shape: f32[32,32], index: 9, kind: input, shape index: {}]   ;;  %s2479_s10 = inlined_call_operand.vmem [shape: f32[32,16], index: 10, kind: input, shape index: {}]   ;;  %s2480_s11 = inlined_call_operand.vmem [shape: f32[32,32], index: 11, kind: input, shape index: {}]   ;;  %s2481_s12 = inlined_call_operand.vmem [shape: f32[32,32], index: 12, kind: input, shape index: {}]   ;;  %s2482_s13 = inlined_call_operand.vmem [shape: f32[32,32], index: 13, kind: input, shape index: {}]   ;;  %s2483_s14 = inlined_call_operand.vmem [shape: f32[32,1], index: 14, kind: input, shape index: {}]   ;;  %s2484_s15 = inlined_call_operand.vmem [shape: f32[8,128], index: 15, kind: input, shape index: {}]   ;;  %s2485_s16 = inlined_call_operand.hbm [shape: f32[2,1,128], index: 16, kind: output, shape index: {}]  }
   0x1   :  { %2492 = sst [smem:[#allocation19_spill]] %s2469_s0 }
   0x2   :  { %2493 = sst [smem:[#allocation20_spill]] %s2471_s2 }
   0x3   :  { %2494 = sst [smem:[#allocation21_spill]] %s2472_s3 }
   0x4   :  { %2495 = sst [smem:[#allocation22_spill]] %s2473_s4 }
   0x5   :  { %2496 = sst [smem:[#allocation23_spill]] %s2475_s6 }
   0x6   :  { %2497 = sst [smem:[#allocation24_spill]] %s2482_s13 }
   0x7   :  { %2498 = sst [smem:[#allocation25_spill]] %s2485_s16 }
   0x8   :  { %21 = vsyncpa [#allocation3], 0 }
   0x9   :  { %23 = vsyncpa [#allocation3 + $0x1], 0 }
   0xa   :  { %24 = vsyncpa [#allocation6], 0 }
   0xb   :  { %25 = vsyncpa [#allocation9], 0 }
   0xc   :  { %26 = vsyncpa [#allocation4], 0 }
   0xd   :  { %28 = vsyncpa [#allocation4 + $0x1], 0  ;;  %s2018_s21 = smov 0   ;;  %s2020_s22 = smov 0  }
   0xe   :  { %s2022_s23 = smov 0   ;;  %s2024_s24 = smov 0  }
   0xf LB: > { %2499 = sst [smem:[#allocation16_spill]] %s1920_s23  ;;  %s2042_s28 = sadd.s32 4294967295, %s1924_s24   ;;  %s1924_s24 = sphi %s2024_s24, %s2517_s24   ;;  %s1920_s23 = sphi %s2022_s23, %s2519_s23   ;;  %s1916_s22 = sphi %s2020_s22, %s2521_s22   ;;  %s1912_s21 = sphi %s2018_s21, %s2520_s21  }
  0x10   : > { %s2500_s2 = sld [smem:[#allocation20_spill]]  ;;  %p1537_p0 = scmp.ge.s32.totalorder %s1924_s24, 1 }
  0x11   : > { %p55_p1 = scmp.eq.s32.totalorder %s2042_s28, 0  ;;  %p411_p2 = scmp.lt.s32.totalorder %s1924_s24, 3 }
  0x12   : > { %s1926_s30 = smov [#allocation5]   ;;  %s2502_s4 = sld [smem:[#allocation22_spill]] }
  0x13   : > { %p2047_p3 = pnand %p1537_p0, %p411_p2  ;;  %s425_s0 = sshll.u32 %s1926_s30, 4  ;;  %s426_s0 = int_to_ptr.vmem [resolvable:$true] %s425_s0 }
  0x14   : > { %s1927_s25 = smov [#allocation8]   ;;  %s1928_s30 = smov 128  }
  0x15   : > { %p1586_p5 = pneg %p2047_p3  ;;  %s448_s26 = sshll.u32 %s1927_s25, 4  ;;  %s449_s26 = int_to_ptr.vmem [resolvable:$true] %s448_s26 }
  0x16   : > { %s423_s27 = sshll.u32 %s2500_s2, 4  ;;  %s1929_s17 = smov 8   ;;  %s424_s27 = int_to_ptr.hbm [resolvable:$true] %s423_s27 }
  0x17   : > { %p2059_p6 = pnand %p1586_p5, %p55_p1  ;;  %s2504_s3 = sld [smem:[#allocation21_spill]] }
  0x18   : > { %s446_s19 = sshll.u32 %s2502_s4, 4  ;;  %s1930_s25 = smov [#allocation7]   ;;  %s447_s19 = int_to_ptr.hbm [resolvable:$true] %s446_s19 }
  0x19   : > { %1589 = dma.hbm_to_vmem [thread:$0]  (!%p2059_p6), %s424_s27, 32, %s426_s0, [#allocation6]  }
  0x1a   : > { %1595 = dma.hbm_to_vmem [thread:$0]  (!%p2059_p6), %s447_s19, 256, %s449_s26, [#allocation9], %s1928_s30, %s1928_s30, %s1929_s17  }
  0x1b   : > { %s437_s16 = sshll.u32 %s1930_s25, 4  ;;  %s2505_s6 = sld [smem:[#allocation23_spill]]  ;;  %s438_s16 = int_to_ptr.vmem [resolvable:$true] %s437_s16 }
  0x1c   : > { %s1931_s2 = smov [#allocation10]   ;;  %s1536_s26 = sadd.s32 4294967294, %s1924_s24  }
  0x1d   : > { %s435_s4 = sshll.u32 %s2504_s3, 4  ;;  %s465_s19 = sshll.u32 %s1931_s2, 4  ;;  %s436_s4 = int_to_ptr.hbm [resolvable:$true] %s435_s4  ;;  %s466_s19 = int_to_ptr.vmem [resolvable:$true] %s465_s19 }
  0x1e   : > { %1592 = dma.hbm_to_vmem [thread:$0]  (!%p2059_p6), %s436_s4, 16, %s438_s16, [#allocation6]  }
  0x1f   : > { %s2079_s18 = sadd.s32 1, %s1924_s24   ;;  %s41_s27 = sadd.s32 1, %s1920_s23 }
  0x20   : > { %2506 = sst [smem:[#allocation17_spill]] %s2079_s18  ;;  %s38_s25 = ssub.s32 %s1924_s24, %s2079_s18 }
  0x21   : > { %s463_s13 = sshll.u32 %s2505_s6, 4  ;;  %p39_p7 = scmp.eq.s32.totalorder %s38_s25, 0  ;;  %s464_s13 = int_to_ptr.hbm [resolvable:$true] %s463_s13 }
  0x22   : > { %1598 = dma.hbm_to_vmem [thread:$0]  (!%p2059_p6), %s464_s13, 256, %s466_s19, [#allocation9], %s1928_s30, %s1928_s30, %s1929_s17  }
  0x23   : > { %p48_p8 = scmp.ne.s32.totalorder %s1920_s23, %s1916_s22  ;;  %p49_p9 = scmp.eq.s32.totalorder %s1924_s24, 0 }
  0x24   : > { %p54_p10 = scmp.ne.s32.totalorder %s1916_s22, %s1912_s21  ;;  %p398_p13 = scmp.eq.s32.totalorder %s2042_s28, 1 }
  0x25   : > { %s2090_s4 = scalar_select %p39_p7, %s1920_s23, %s41_s27  }
  0x26   : > { %p2092_p11 = por %p49_p9, %p48_p8  ;;  %p2098_p12 = por %p55_p1, %p54_p10 }
  0x27   : > { %2507 = sst [smem:[#allocation18_spill]] %s2090_s4  ;;  %p404_p0 = scmp.eq.s32.totalorder %s1536_s26, 1 }
  0x28   : > { %p1611_p2 = scmp.lt.s32.totalorder %s1924_s24, 2  ;;  %s506_s20 = sand.u32 1, %s1920_s23  }
  0x29   : > { %p2105_p5 = por %p398_p13, %p48_p8  ;;  %p2109_p6 = por %p404_p0, %p54_p10 }
  0x2a   : > { %s2512_s19 = sld [smem:[#allocation19_spill]]  ;;  %s509_s27 = scalar_lea.vmem [#allocation2], %s506_s20 }
  0x2b   : > { %s516_s3 = sshll.u32 %s509_s27, 4  ;;  %p2119_p7 = pnand %p1611_p2, %p2092_p11  ;;  %s517_s3 = int_to_ptr.vmem [resolvable:$true] %s516_s3 }
  0x2c   : > { %s507_s4 = scalar_lea.sflag [#allocation3], %s506_s20 }
  0x2d   : > { %p1824_p9 = pneg %p2119_p7 }
  0x30   : > { %s512_s25 = scalar_lea.hbm %s2512_s19, %s1924_s24 }
  0x31   : > { %s514_s6 = sshll.u32 %s512_s25, 4  ;;  %s1827_s25 = scalar_lea.hbm %s2512_s19, 2  ;;  %s515_s6 = int_to_ptr.hbm [resolvable:$true] %s514_s6 }
  0x32   : > { %s1820_s23 = sshra.s32 %s515_s6, 4  ;;  %s1821_s23 = int_to_ptr.hbm [resolvable:$true] %s1820_s23 }
  0x33   : > { %s1822_s18 = scalar_lea.hbm %s1821_s23, 1  ;;  %p1828_p11 = scmp.lt.s32.totalorder %s1821_s23, %s2512_s19 }
  0x34   : > { %p1823_p8 = scmp.ne.s32.totalorder %s1821_s23, %s1822_s18  ;;  %p1829_p0 = scmp.lt.s32.totalorder %s1827_s25, %s1822_s18 }
  0x36   : > { %p1825_p10 = pnand %p1824_p9, %p1823_p8  ;;  %p1830_p2 = por %p1829_p0, %p1828_p11 }
  0x38   : > { %p1826_p13 = pneg %p1825_p10 }
  0x3a   : > { %p1831_p4 = pnand %p1830_p2, %p1826_p13 }
  0x3c   : > { %1834 = shalt.err (!%p1831_p4)
}
  0x3d   : > { %1602 = dma.hbm_to_vmem [thread:$0]  (!%p2119_p7), %s515_s6, 16, %s517_s3, %s507_s4  }
  0x3e   : > { %531 = sbr.rel (%p2047_p3) target bundleno = 1744 (0x6d0), region = 84  ;;  %s2136_s20 = sand.u32 (!%p2047_p3), 1, %s1916_s22  }
  0x3f   : > { %s534_s0 = scalar_lea.sflag (!%p2047_p3), [#allocation3], %s2136_s20  ;;  %s536_s2 = scalar_lea.vmem (!%p2047_p3), [#allocation2], %s2136_s20 }
  0x43   : > { %1895 = dma.done.wait (%p2098_p12), %s534_s0, 16  }
  0x44   : > { %1897 = vsyncadd (%p2098_p12), %s534_s0, 4294967280 }
  0x45   : > { %1899 = dma.done.wait (%p55_p1), [#allocation6], 48  }
  0x46   : > { %1901 = vsyncadd (%p55_p1), [#allocation6], 4294967248 }
  0x47   : > { %1903 = dma.done.wait (%p55_p1), [#allocation9], 512  }
  0x48   : > { %1905 = vsyncadd (%p55_p1), [#allocation9], 4294966784  ;;  %v1932_v0 = vmov 0   ;;  %v706_v1 = vld [vmem:[%s2477_s8 + $0x18] sm:$0xff]  ;;  %v704_v2 = vld [vmem:[%s2477_s8 + $0x8] sm:$0xff]  ;;  %vm612_vm0 = vcmask 1040384  }
  0x49   : > { %1657 = vset.pattern.permute.xlu1 %v1932_v0  ;;  %1656 = vset.pattern.permute.xlu0 %v1932_v0  ;;  %v705_v3 = vld [vmem:[%s2477_s8 + $0x10] sm:$0xff]  ;;  %v703_v4 = vld [vmem:[%s2477_s8] sm:$0xff]  ;;  %p607_p1 = scmp.lt.s32.totalorder %s2042_s28, 1  ;;  %vm637_vm14 = vcmask 130048   ;;  %s2515_s26 = sld [smem:[#allocation25_spill]] }
  0x4a   : > { %1658 = vset.pattern.permute.xlu2 %v1932_v0  ;;  %724 = vperm.xlu0 %1656, %v706_v1   ;;  %v1659_v5 = vld [vmem:[%s536_s2] ss:$0 sm:$0xff]  ;;  %v2192_v46 = vld [vmem:[%s2484_s15 + $0x1] ss:$0 sm:$0xff]  ;;  %s606_s27 = scalar_lea.vmem [#allocation11], %s2136_s20  ;;  %s1415_s3 = scalar_lea.sflag [#allocation4], %s2136_s20 }
  0x4b   : > { %714 = vperm.xlu1 %1657, %v704_v2   ;;  %v610_v12 = vld [vmem:[%s536_s2] sm:$0x1]  ;;  %s608_s25 = scalar_select %p607_p1, %s2042_s28, 1 }
  0x4c   : > { %v613_v14 = vsel %vm612_vm0, %v610_v12, 0.0  ;;  %v2187_v41 = vld [vmem:[%s2484_s15] ss:$0 sm:$0xff]  ;;  %s1425_s16 = sshll.u32 %s606_s27, 4  ;;  %s1426_s16 = int_to_ptr.vmem [resolvable:$true] %s1425_s16 }
  0x4d   : > { %s609_s0 = scalar_lea.vmem %s2470_s1, %s608_s25 }
  0x4e   : > { %v611_v20 = vld [vmem:[%s609_s0] sm:$0x1]  ;;  %s2514_s0 = sld [smem:[#allocation24_spill]] }
  0x4f   : > { %s1423_s25 = scalar_lea.hbm %s2515_s26, %s2042_s28  ;;  %s1870_s28 = scalar_lea.hbm %s2515_s26, 2 }
  0x50   : > { %s1427_s2 = sshll.u32 %s1423_s25, 4  ;;  %s1428_s2 = int_to_ptr.hbm [resolvable:$true] %s1427_s2 }
  0x51   : > { %s1864_s6 = sshra.s32 %s1428_s2, 4  ;;  %s1865_s6 = int_to_ptr.hbm [resolvable:$true] %s1864_s6 }
  0x52   : > { %719 = vperm.xlu0 %1656, %v705_v3   ;;  %s1866_s23 = scalar_lea.hbm %s1865_s6, 1  ;;  %p1871_p7 = scmp.lt.s32.totalorder %s1865_s6, %s2515_s26 }
  0x53   : > { %709 = vperm.xlu1 %1657, %v703_v4   ;;  %p1867_p3 = scmp.ne.s32.totalorder %s1865_s6, %s1866_s23  ;;  %p1872_p8 = scmp.lt.s32.totalorder %s1870_s28, %s1866_s23 }
  0x55   : > { %p1868_p4 = pnand %p1867_p3, %p2105_p5  ;;  %p1873_p9 = por %p1872_p8, %p1871_p7 }
  0x57   : > { %p1869_p12 = pneg %p1868_p4 }
  0x59   : > { %p1874_p10 = pnand %p1873_p9, %p1869_p12 }
  0xbc   : > { %v725_v6 = vpop.permute.xlu0 %724 }
  0xbd   : > { %v715_v7 = vpop.permute.xlu1 %714  ;;  %v733_v8 = vmul.f32 %v1659_v5, %v725_v6 }
  0xbe   : > { %v2164_v9 = vmul.f32 %v1659_v5, %v715_v7 }
  0xbf   : > { %742 = vadd.xlane.f32.xlu2 %v733_v8  ;;  %v747_v10 = vmul.f32 %v733_v8, %v733_v8 }
  0xc0   : > { %738 = vadd.xlane.f32.xlu1 %v2164_v9  ;;  %v745_v18 = vmul.f32 %v2164_v9, %v2164_v9 }
  0xc1   : > { %754 = vadd.xlane.f32.xlu0 %v747_v10 }
  0xc4   : > { %v720_v11 = vpop.permute.xlu0 %719 }
  0xc5   : > { %v2167_v13 = vmul.f32 %v1659_v5, %v720_v11  ;;  %v710_v15 = vpop.permute.xlu1 %709 }
  0xc6   : > { %v2170_v16 = vmul.f32 %v1659_v5, %v710_v15 }
  0xc7   : > { %740 = vadd.xlane.f32.xlu2 %v2167_v13  ;;  %v746_v17 = vmul.f32 %v2167_v13, %v2167_v13 }
  0xc8   : > { %v744_v19 = vmul.f32 %v2170_v16, %v2170_v16 }
  0xc9   : > { %614 = vadd.xlane.f32.xlu0 %v613_v14  ;;  %v618_v14 = vld [vmem:[#allocation5 + $0x1] sm:$0x1] }
  0xcf   : > { %736 = vadd.xlane.f32.xlu2 %v2170_v16 }
  0xd7   : > { %752 = vadd.xlane.f32.xlu2 %v746_v17 }
  0xdf   : > { %750 = vadd.xlane.f32.xlu2 %v745_v18 }
  0xe7   : > { %748 = vadd.xlane.f32.xlu2 %v744_v19 }
  0xff   : > { %621 = vperm.xlu2 %1658, %v611_v20  }
 0x132   : > { %v743_v21 = vpop.xlane.xlu2 %742 }
 0x133   : > { %v759_v22 = vmul.f32 0.0078125, %v743_v21  ;;  %v739_v44 = vpop.xlane.xlu1 %738 }
 0x134   : > { %v755_v23 = vpop.xlane.xlu0 %754  ;;  %v2195_v49 = vmul.f32 0.0078125, %v739_v44 }
 0x135   : > { %v767_v24 = vmul.f32 %v759_v22, %v759_v22  ;;  %v763_v25 = vmul.f32 0.0078125, %v755_v23  ;;  %v819_v40 = vsub.f32 %v733_v8, %v759_v22  ;;  %v616_v8 = vld [vmem:[#allocation5] sm:$0x1] }
 0x136   : > { %v765_v52 = vmul.f32 %v2195_v49, %v2195_v49 }
 0x137   : > { %v771_v26 = vsub.f32 %v763_v25, %v767_v24  ;;  %v627_v25 = vld [vmem:[#allocation7] sm:$0x1] }
 0x139   : > { %v775_v27 = vadd.f32 1e-05, %v771_v26 }
 0x13a   : > { %v741_v28 = vpop.xlane.xlu2 %740 }
 0x13b   : > { %1668 = vrsqrt.f32 %v775_v27  ;;  %v758_v34 = vmul.f32 0.0078125, %v741_v28  ;;  %vm812_vm2 = vweird.f32 %v775_v27 }
 0x13c   : > { %v615_v10 = vpop.xlane.xlu0 %614 }
 0x13d   : > { %v766_v38 = vmul.f32 %v758_v34, %v758_v34  ;;  %v818_v11 = vsub.f32 %v2167_v13, %v758_v34  ;;  %v617_v19 = vmul.f32 %v616_v8, %v615_v10  ;;  %v655_v8 = vld [vmem:[#allocation10 + $0x8] sm:$0xff] }
 0x141   : > { %v1669_v29 = vpop.eup %1668 }
 0x142   : > { %v737_v30 = vpop.xlane.xlu2 %736  ;;  %v807_v31 = vmul.f32 %v1669_v29, %v775_v27  ;;  %vm813_vm1 = vweird.f32 %v1669_v29 }
 0x143   : > { %vm814_vm3 = vmor %vm812_vm2, %vm813_vm1  ;;  %v2200_v58 = vmul.f32 0.0078125, %v737_v30  ;;  %v817_v30 = vsub.f32 %v2164_v9, %v2195_v49 }
 0x144   : > { %v808_v32 = vmul.f32 %v1669_v29, %v807_v31 }
 0x145   : > { %v764_v63 = vmul.f32 %v2200_v58, %v2200_v58 }
 0x146   : > { %v809_v33 = vmul.f32 0.5, %v808_v32 }
 0x148   : > { %v810_v35 = vsub.f32 1.5, %v809_v33 }
 0x14a   : > { %v753_v36 = vpop.xlane.xlu2 %752  ;;  %v811_v37 = vmul.f32 %v1669_v29, %v810_v35 }
 0x14b   : > { %v762_v39 = vmul.f32 0.0078125, %v753_v36 }
 0x14c   : > { %v815_v43 = vsel %vm814_vm3, %v1669_v29, %v811_v37 }
 0x14d   : > { %v770_v42 = vsub.f32 %v762_v39, %v766_v38  ;;  %v823_v45 = vmul.f32 %v819_v40, %v815_v43  ;;  %v633_v40 = vld [vmem:[#allocation8 + $0x8] sm:$0xff] }
 0x14f   : > { %v774_v47 = vadd.f32 1e-05, %v770_v42  ;;  %v828_v48 = vmul.f32 %v2187_v41, %v823_v45  ;;  %v632_v42 = vld [vmem:[#allocation8] sm:$0xff] }
 0x151   : > { %1670 = vrsqrt.f32 %v774_v47  ;;  %v833_v51 = vadd.f32 %v2192_v46, %v828_v48  ;;  %vm802_vm6 = vweird.f32 %v774_v47 }
 0x152   : > { %v751_v50 = vpop.xlane.xlu2 %750 }
 0x153   : > { %v761_v53 = vmul.f32 0.0078125, %v751_v50  ;;  %vm837_vm4 = vcmp.ge.f32.partialorder %v833_v51, 0.0  ;;  %v841_v54 = vmul.f32 0.01, %v833_v51  ;;  %v816_v50 = vsub.f32 %v2170_v16, %v2200_v58  ;;  %v645_v58 = vld [vmem:[%s2474_s5 + $0x8] sm:$0xff] }
 0x155   : > { %v769_v55 = vsub.f32 %v761_v53, %v765_v52  ;;  %v845_v56 = vsel %vm837_vm4, %v833_v51, %v841_v54 }
 0x156   : > { %875 = vmatpush.msra.mxu0 %v845_v56 }
 0x157   : > { %v1671_v57 = vpop.eup %1670  ;;  %v773_v59 = vadd.f32 1e-05, %v769_v55 }
 0x158   : > { %v797_v60 = vmul.f32 %v1671_v57, %v774_v47  ;;  %vm803_vm5 = vweird.f32 %v1671_v57 }
 0x159   : > { %1672 = vrsqrt.f32 %v773_v59  ;;  %vm804_vm7 = vmor %vm802_vm6, %vm803_vm5  ;;  %vm792_vm9 = vweird.f32 %v773_v59  ;;  %vm850_vm5 = vcmask 261120  }
 0x15a   : > { %v798_v61 = vmul.f32 %v1671_v57, %v797_v60  ;;  %v749_v62 = vpop.xlane.xlu2 %748 }
 0x15b   : > { %v760_v0 = vmul.f32 0.0078125, %v749_v62 }
 0x15c   : > { %v799_v1 = vmul.f32 0.5, %v798_v61  ;;  %v644_v61 = vld [vmem:[%s2474_s5] sm:$0xff] }
 0x15d   : > { %v768_v2 = vsub.f32 %v760_v0, %v764_v63 }
 0x15e   : > { %v800_v3 = vsub.f32 1.5, %v799_v1 }
 0x15f   : > { %v1673_v4 = vpop.eup %1672  ;;  %v772_v5 = vadd.f32 1e-05, %v768_v2 }
 0x160   : > { %v801_v6 = vmul.f32 %v1671_v57, %v800_v3  ;;  %v787_v7 = vmul.f32 %v1673_v4, %v773_v59  ;;  %vm793_vm8 = vweird.f32 %v1673_v4 }
 0x161   : > { %1674 = vrsqrt.f32 %v772_v5  ;;  %vm794_vm10 = vmor %vm792_vm9, %vm793_vm8  ;;  %vm782_vm15 = vweird.f32 %v772_v5 }
 0x162   : > { %v788_v12 = vmul.f32 %v1673_v4, %v787_v7  ;;  %v622_v15 = vpop.permute.xlu2 %621  ;;  %v805_v17 = vsel %vm804_vm7, %v1671_v57, %v801_v6  ;;  %v848_v6 = vld [vmem:[%s2478_s9 + $0x10] sm:$0xff]  ;;  %v849_v7 = vld [vmem:[%s2478_s9 + $0x18] sm:$0xff] }
 0x163   : > { %v624_v18 = vperm.slane %v622_v15, 0  ;;  %v822_v20 = vmul.f32 %v818_v11, %v805_v17  ;;  %v654_v11 = vld [vmem:[#allocation10] sm:$0xff] }
 0x164   : > { %v789_v21 = vmul.f32 0.5, %v788_v12 }
 0x165   : > { %v625_v22 = vmul.f32 %v624_v18, %v618_v14  ;;  %v827_v23 = vmul.f32 %v2187_v41, %v822_v20 }
 0x166   : > { %v790_v24 = vsub.f32 1.5, %v789_v21 }
 0x167   : > { %v1675_v26 = vpop.eup %1674  ;;  %v626_v27 = vadd.f32 %v625_v22, %v617_v19  ;;  %v832_v13 = vadd.f32 %v2192_v46, %v827_v23 }
 0x168   : > { %v791_v28 = vmul.f32 %v1673_v4, %v790_v24  ;;  %v777_v29 = vmul.f32 %v1675_v26, %v772_v5  ;;  %vm783_vm13 = vweird.f32 %v1675_v26  ;;  %v847_v5 = vld [vmem:[%s2478_s9 + $0x8] sm:$0xff] }
 0x169   : > { %v628_v31 = vadd.f32 %v627_v25, %v626_v27  ;;  %vm836_vm11 = vcmp.ge.f32.partialorder %v832_v13, 0.0  ;;  %v840_v32 = vmul.f32 0.01, %v832_v13  ;;  %vm784_vm0 = vmor %vm782_vm15, %vm783_vm13  ;;  %v677_v25 = vld [vmem:[%s2476_s7] sm:$0x1] }
 0x16a   : > { %v778_v33 = vmul.f32 %v1675_v26, %v777_v29  ;;  %v795_v34 = vsel %vm794_vm10, %v1673_v4, %v791_v28  ;;  %v846_v4 = vld [vmem:[%s2478_s9] sm:$0xff]  ;;  %v685_v29 = vld [vmem:[%s2479_s10 + $0x18] sm:$0xff] }
 0x16b   : > { %v630_v35 = vmul.f32 0.01, %v628_v31  ;;  %v844_v36 = vsel %vm836_vm11, %v832_v13, %v840_v32  ;;  %vm629_vm12 = vcmp.ge.f32.partialorder %v628_v31, 0.0  ;;  %v821_v37 = vmul.f32 %v817_v30, %v795_v34  ;;  %v684_v30 = vld [vmem:[%s2479_s10 + $0x10] sm:$0xff] }
 0x16c   : > { %v779_v38 = vmul.f32 0.5, %v778_v33  ;;  %876 = vmatpush.msra.mxu0 %v844_v36  ;;  %v683_v36 = vld [vmem:[%s2479_s10 + $0x8] sm:$0xff] }
 0x16d   : > { %v631_v39 = vsel %vm629_vm12, %v628_v31, %v630_v35  ;;  %v826_v43 = vmul.f32 %v2187_v41, %v821_v37 }
 0x16e   : > { %v780_v44 = vsub.f32 1.5, %v779_v38  ;;  %v634_v9 = vperm.slane %v631_v39, 0  ;;  %v682_v39 = vld [vmem:[%s2479_s10] sm:$0xff] }
 0x16f   : > { %v831_v45 = vadd.f32 %v2192_v46, %v826_v43 }
 0x170   : > { %v781_v47 = vmul.f32 %v1675_v26, %v780_v44  ;;  %v636_v48 = vmul.f32 %v634_v9, %v633_v40  ;;  %v635_v49 = vmul.f32 %v634_v9, %v632_v42 }
 0x171   : > { %vm835_vm1 = vcmp.ge.f32.partialorder %v831_v45, 0.0  ;;  %v839_v51 = vmul.f32 0.01, %v831_v45 }
 0x172   : > { %v641_v52 = vsel %vm637_vm14, %v636_v48, 0.0  ;;  %v638_v53 = vsel %vm637_vm14, %v635_v49, 0.0  ;;  %v785_v54 = vsel %vm784_vm0, %v1675_v26, %v781_v47 }
 0x173   : > { %642 = vadd.xlane.f32.xlu0 %v641_v52  ;;  %639 = vadd.xlane.f32.xlu1 %v638_v53  ;;  %v843_v55 = vsel %vm835_vm1, %v831_v45, %v839_v51  ;;  %v820_v56 = vmul.f32 %v816_v50, %v785_v54 }
 0x174   : > { %877 = vmatpush.msra.mxu0 %v843_v55 }
 0x175   : > { %v825_v57 = vmul.f32 %v2187_v41, %v820_v56 }
 0x177   : > { %v830_v59 = vadd.f32 %v2192_v46, %v825_v57 }
 0x179   : > { %vm834_vm2 = vcmp.ge.f32.partialorder %v830_v59, 0.0  ;;  %v838_v60 = vmul.f32 0.01, %v830_v59 }
 0x17b   : > { %v842_v16 = vsel %vm834_vm2, %v830_v59, %v838_v60 }
 0x17c   : > { %878 = vmatpush.msra.mxu0 %v842_v16 }
 0x17d   : > { %1548 = vmatmul.msk.f32.vlgmr.msra.gmra.mxu0 %vm850_vm5, %v846_v4 }
 0x185   : > { %1549 = vmatmul.msk.f32.gmra.mxu0 %vm850_vm5, %v847_v5 }
 0x18d   : > { %1550 = vmatmul.msk.f32.gmra.mxu0 %vm850_vm5, %v848_v6 }
 0x195   : > { %1551 = vmatmul.msk.f32.gmra.mxu0 %vm850_vm5, %v849_v7 }
 0x1e6   : > { %v643_v62 = vpop.xlane.xlu0 %642  ;;  %v640_v63 = vpop.xlane.xlu1 %639 }
 0x1e7   : > { %v647_v0 = vadd.f32 %v645_v58, %v643_v62  ;;  %v646_v1 = vadd.f32 %v644_v61, %v640_v63 }
 0x1e9   : > { %v651_v2 = vmul.f32 0.01, %v647_v0  ;;  %v650_v41 = vmul.f32 0.01, %v646_v1  ;;  %vm649_vm3 = vcmp.ge.f32.partialorder %v647_v0, 0.0  ;;  %vm648_vm4 = vcmp.ge.f32.partialorder %v646_v1, 0.0 }
 0x1eb   : > { %v653_v46 = vsel %vm649_vm3, %v647_v0, %v651_v2  ;;  %v652_v3 = vsel %vm648_vm4, %v646_v1, %v650_v41 }
 0x1ec   : > { %663 = vperm.xlu2 %1658, %v653_v46   ;;  %658 = vperm.xlu1 %1657, %v652_v3  }
 0x1fa   : > { %v880_v43 = vpop.f32.mrf.mxu0 }
 0x202   : > { %v883_v44 = vpop.f32.mrf.mxu0 }
 0x20a   : > { %v886_v9 = vpop.f32.mrf.mxu0 }
 0x212   : > { %v889_v45 = vpop.f32.mrf.mxu0 }
 0x246   : > { %v664_v10 = vpop.permute.xlu2 %663 }
 0x247   : > { %v667_v12 = vmul.f32 %v664_v10, %v655_v8 }
 0x249   : > { %v669_v17 = vsel %vm637_vm14, %v667_v12, 0.0 }
 0x25e   : > { %v659_v14 = vpop.permute.xlu1 %658 }
 0x25f   : > { %v666_v15 = vmul.f32 %v659_v14, %v654_v11 }
 0x261   : > { %v668_v18 = vsel %vm637_vm14, %v666_v15, 0.0 }
 0x262   : > { %v670_v19 = vadd.f32 %v669_v17, %v668_v18 }
 0x264   : > { %v671_v20 = vrot.slane %v670_v19, 4 }
 0x266   : > { %v672_v21 = vadd.f32 %v671_v20, %v670_v19 }
 0x268   : > { %v673_v22 = vrot.slane %v672_v21, 2 }
 0x26a   : > { %v674_v23 = vadd.f32 %v673_v22, %v672_v21 }
 0x26c   : > { %v675_v24 = vrot.slane %v674_v23, 1 }
 0x26e   : > { %v676_v26 = vadd.f32 %v675_v24, %v674_v23 }
 0x270   : > { %v678_v27 = vadd.f32 %v677_v25, %v676_v26 }
 0x272   : > { %vm679_vm6 = vcmp.ge.f32.partialorder %v678_v27, 0.0  ;;  %v680_v13 = vmul.f32 0.01, %v678_v27 }
 0x274   : > { %v681_v28 = vsel %vm679_vm6, %v678_v27, %v680_v13 }
 0x275   : > { %v686_v31 = vperm.slane %v681_v28, 0 }
 0x277   : > { %v690_v32 = vmul.f32 %v686_v31, %v685_v29  ;;  %v689_v33 = vmul.f32 %v686_v31, %v684_v30  ;;  %v688_v37 = vmul.f32 %v686_v31, %v683_v36  ;;  %v687_v40 = vmul.f32 %v686_v31, %v682_v39 }
 0x279   : > { %v700_v34 = vsel %vm637_vm14, %v690_v32, 0.0  ;;  %v697_v35 = vsel %vm637_vm14, %v689_v33, 0.0  ;;  %v694_v38 = vsel %vm637_vm14, %v688_v37, 0.0  ;;  %v691_v42 = vsel %vm637_vm14, %v687_v40, 0.0 }
 0x27a   : > { %701 = vadd.xlane.f32.xlu0 %v700_v34  ;;  %698 = vadd.xlane.f32.xlu2 %v697_v35 }
 0x282   : > { %695 = vadd.xlane.f32.xlu0 %v694_v38 }
 0x28a   : > { %692 = vadd.xlane.f32.xlu0 %v691_v42 }
 0x2ed   : > { %v702_v47 = vpop.xlane.xlu0 %701  ;;  %v699_v48 = vpop.xlane.xlu2 %698 }
 0x2ee   : > { %v2260_v49 = vadd.f32 %v889_v45, %v702_v47  ;;  %v2262_v50 = vadd.f32 %v886_v9, %v699_v48 }
 0x2f0   : > { %900 = vadd.xlane.f32.xlu1 %v2260_v49  ;;  %898 = vadd.xlane.f32.xlu0 %v2262_v50  ;;  %v904_v51 = vmul.f32 %v2262_v50, %v2262_v50  ;;  %v905_v57 = vmul.f32 %v2260_v49, %v2260_v49 }
 0x2f2   : > { %910 = vadd.xlane.f32.xlu2 %v904_v51 }
 0x2f5   : > { %v696_v52 = vpop.xlane.xlu0 %695 }
 0x2f6   : > { %v2268_v53 = vadd.f32 %v883_v44, %v696_v52 }
 0x2f8   : > { %896 = vadd.xlane.f32.xlu0 %v2268_v53  ;;  %v903_v54 = vmul.f32 %v2268_v53, %v2268_v53 }
 0x2fa   : > { %908 = vadd.xlane.f32.xlu2 %v903_v54 }
 0x2fd   : > { %v693_v55 = vpop.xlane.xlu0 %692 }
 0x2fe   : > { %v2273_v56 = vadd.f32 %v880_v43, %v693_v55  ;;  %v1662_v43 = vld [vmem:[%s2484_s15 + $0x2] ss:$0 sm:$0xff] }
 0x300   : > { %894 = vadd.xlane.f32.xlu0 %v2273_v56  ;;  %v902_v59 = vmul.f32 %v2273_v56, %v2273_v56 }
 0x308   : > { %912 = vadd.xlane.f32.xlu0 %v905_v57 }
 0x310   : > { %906 = vadd.xlane.f32.xlu0 %v902_v59 }
 0x363   : > { %v899_v60 = vpop.xlane.xlu0 %898  ;;  %v901_v8 = vpop.xlane.xlu1 %900 }
 0x364   : > { %v916_v16 = vmul.f32 0.0078125, %v899_v60  ;;  %v917_v11 = vmul.f32 0.0078125, %v901_v8 }
 0x365   : > { %v911_v58 = vpop.xlane.xlu2 %910 }
 0x366   : > { %v924_v61 = vmul.f32 %v916_v16, %v916_v16  ;;  %v920_v62 = vmul.f32 0.0078125, %v911_v58  ;;  %v925_v18 = vmul.f32 %v917_v11, %v917_v11  ;;  %v976_v38 = vsub.f32 %v2262_v50, %v916_v16  ;;  %v1663_v50 = vld [vmem:[%s2484_s15 + $0x3] ss:$0 sm:$0xff] }
 0x367   : > { %v977_v52 = vsub.f32 %v2260_v49, %v917_v11 }
 0x368   : > { %v928_v63 = vsub.f32 %v920_v62, %v924_v61 }
 0x36a   : > { %v932_v0 = vadd.f32 1e-05, %v928_v63 }
 0x36b   : > { %v897_v1 = vpop.xlane.xlu0 %896 }
 0x36c   : > { %v915_v2 = vmul.f32 0.0078125, %v897_v1  ;;  %1676 = vrsqrt.f32 %v932_v0  ;;  %vm960_vm8 = vweird.f32 %v932_v0 }
 0x36d   : > { %v909_v41 = vpop.xlane.xlu2 %908 }
 0x36e   : > { %v923_v46 = vmul.f32 %v915_v2, %v915_v2  ;;  %v919_v3 = vmul.f32 0.0078125, %v909_v41  ;;  %v975_v42 = vsub.f32 %v2268_v53, %v915_v2 }
 0x370   : > { %v927_v4 = vsub.f32 %v919_v3, %v923_v46 }
 0x372   : > { %v931_v5 = vadd.f32 1e-05, %v927_v4  ;;  %v1677_v7 = vpop.eup %1676 }
 0x373   : > { %v895_v6 = vpop.xlane.xlu0 %894  ;;  %v955_v10 = vmul.f32 %v1677_v7, %v932_v0  ;;  %vm961_vm7 = vweird.f32 %v1677_v7 }
 0x374   : > { %1678 = vrsqrt.f32 %v931_v5  ;;  %v2280_v23 = vmul.f32 0.0078125, %v895_v6  ;;  %vm962_vm10 = vmor %vm960_vm8, %vm961_vm7  ;;  %vm950_vm11 = vweird.f32 %v931_v5 }
 0x375   : > { %v956_v14 = vmul.f32 %v1677_v7, %v955_v10 }
 0x376   : > { %v922_v13 = vmul.f32 %v2280_v23, %v2280_v23  ;;  %v974_v49 = vsub.f32 %v2273_v56, %v2280_v23  ;;  %v1004_v56 = vld [vmem:[%s2480_s11] sm:$0xff] }
 0x377   : > { %v957_v22 = vmul.f32 0.5, %v956_v14  ;;  %v1006_v14 = vld [vmem:[%s2480_s11 + $0x10] sm:$0xff] }
 0x379   : > { %v958_v26 = vsub.f32 1.5, %v957_v22 }
 0x37a   : > { %v1679_v12 = vpop.eup %1678 }
 0x37b   : > { %v945_v15 = vmul.f32 %v1679_v12, %v931_v5  ;;  %v913_v17 = vpop.xlane.xlu0 %912  ;;  %v959_v31 = vmul.f32 %v1677_v7, %v958_v26  ;;  %vm951_vm9 = vweird.f32 %v1679_v12 }
 0x37c   : > { %v921_v19 = vmul.f32 0.0078125, %v913_v17  ;;  %vm952_vm12 = vmor %vm950_vm11, %vm951_vm9 }
 0x37d   : > { %v946_v20 = vmul.f32 %v1679_v12, %v945_v15  ;;  %v963_v37 = vsel %vm962_vm10, %v1677_v7, %v959_v31  ;;  %v1007_v15 = vld [vmem:[%s2480_s11 + $0x18] sm:$0xff] }
 0x37e   : > { %v929_v21 = vsub.f32 %v921_v19, %v925_v18  ;;  %v980_v44 = vmul.f32 %v976_v38, %v963_v37 }
 0x37f   : > { %v947_v25 = vmul.f32 0.5, %v946_v20 }
 0x380   : > { %v933_v24 = vadd.f32 1e-05, %v929_v21  ;;  %v985_v53 = vmul.f32 %v1662_v43, %v980_v44 }
 0x381   : > { %v948_v29 = vsub.f32 1.5, %v947_v25 }
 0x382   : > { %1680 = vrsqrt.f32 %v933_v24  ;;  %vm970_vm14 = vweird.f32 %v933_v24  ;;  %v990_v58 = vadd.f32 %v1663_v50, %v985_v53 }
 0x383   : > { %v907_v27 = vpop.xlane.xlu0 %906  ;;  %v949_v34 = vmul.f32 %v1679_v12, %v948_v29 }
 0x384   : > { %v918_v28 = vmul.f32 0.0078125, %v907_v27  ;;  %v998_v2 = vmul.f32 0.01, %v990_v58  ;;  %vm994_vm4 = vcmp.ge.f32.partialorder %v990_v58, 0.0 }
 0x385   : > { %v953_v40 = vsel %vm952_vm12, %v1679_v12, %v949_v34  ;;  %v1005_v12 = vld [vmem:[%s2480_s11 + $0x8] sm:$0xff] }
 0x386   : > { %v926_v30 = vsub.f32 %v918_v28, %v922_v13  ;;  %v979_v47 = vmul.f32 %v975_v42, %v953_v40  ;;  %v1002_v5 = vsel %vm994_vm4, %v990_v58, %v998_v2 }
 0x388   : > { %v1681_v32 = vpop.eup %1680  ;;  %v930_v33 = vadd.f32 1e-05, %v926_v30  ;;  %v984_v59 = vmul.f32 %v1662_v43, %v979_v47 }
 0x389   : > { %v965_v35 = vmul.f32 %v1681_v32, %v933_v24  ;;  %vm971_vm13 = vweird.f32 %v1681_v32 }
 0x38a   : > { %1682 = vrsqrt.f32 %v930_v33  ;;  %vm972_vm15 = vmor %vm970_vm14, %vm971_vm13  ;;  %v989_v63 = vadd.f32 %v1663_v50, %v984_v59  ;;  %vm940_vm1 = vweird.f32 %v930_v33 }
 0x38b   : > { %v966_v36 = vmul.f32 %v1681_v32, %v965_v35 }
 0x38c   : > { %v997_v3 = vmul.f32 0.01, %v989_v63  ;;  %vm993_vm6 = vcmp.ge.f32.partialorder %v989_v63, 0.0 }
 0x38d   : > { %v967_v39 = vmul.f32 0.5, %v966_v36 }
 0x38e   : > { %v1001_v7 = vsel %vm993_vm6, %v989_v63, %v997_v3 }
 0x38f   : > { %v968_v9 = vsub.f32 1.5, %v967_v39 }
 0x390   : > { %v1683_v45 = vpop.eup %1682 }
 0x391   : > { %v969_v48 = vmul.f32 %v1681_v32, %v968_v9  ;;  %v935_v51 = vmul.f32 %v1683_v45, %v930_v33  ;;  %vm941_vm0 = vweird.f32 %v1683_v45 }
 0x392   : > { %vm942_vm2 = vmor %vm940_vm1, %vm941_vm0 }
 0x393   : > { %v936_v54 = vmul.f32 %v1683_v45, %v935_v51  ;;  %v973_v55 = vsel %vm972_vm15, %v1681_v32, %v969_v48 }
 0x394   : > { %v981_v57 = vmul.f32 %v977_v52, %v973_v55 }
 0x395   : > { %v937_v60 = vmul.f32 0.5, %v936_v54 }
 0x396   : > { %v986_v16 = vmul.f32 %v1662_v43, %v981_v57 }
 0x397   : > { %v938_v61 = vsub.f32 1.5, %v937_v60 }
 0x398   : > { %v991_v62 = vadd.f32 %v1663_v50, %v986_v16 }
 0x399   : > { %v939_v0 = vmul.f32 %v1683_v45, %v938_v61 }
 0x39a   : > { %vm995_vm3 = vcmp.ge.f32.partialorder %v991_v62, 0.0  ;;  %v999_v1 = vmul.f32 0.01, %v991_v62 }
 0x39b   : > { %v943_v41 = vsel %vm942_vm2, %v1683_v45, %v939_v0 }
 0x39c   : > { %v1003_v46 = vsel %vm995_vm3, %v991_v62, %v999_v1  ;;  %v978_v4 = vmul.f32 %v974_v49, %v943_v41  ;;  %v1664_v41 = vld [vmem:[%s2484_s15 + $0x4] ss:$0 sm:$0xff] }
 0x39d   : > { %1032 = vmatpush.msra.mxu1 %v1003_v46 }
 0x39e   : > { %v983_v6 = vmul.f32 %v1662_v43, %v978_v4 }
 0x39f   : > { %1033 = vmatpush.msra.mxu1 %v1002_v5 }
 0x3a0   : > { %v988_v8 = vadd.f32 %v1663_v50, %v983_v6 }
 0x3a1   : > { %1034 = vmatpush.msra.mxu1 %v1001_v7  ;;  %v1665_v7 = vld [vmem:[%s2484_s15 + $0x5] ss:$0 sm:$0xff] }
 0x3a2   : > { %vm992_vm7 = vcmp.ge.f32.partialorder %v988_v8, 0.0  ;;  %v996_v10 = vmul.f32 0.01, %v988_v8 }
 0x3a4   : > { %v1000_v11 = vsel %vm992_vm7, %v988_v8, %v996_v10 }
 0x3a5   : > { %1035 = vmatpush.msra.mxu1 %v1000_v11 }
 0x3a6   : > { %1552 = vmatmul.msk.f32.vlgmr.msra.gmra.mxu1 %vm850_vm5, %v1004_v56 }
 0x3ae   : > { %1553 = vmatmul.msk.f32.gmra.mxu1 %vm850_vm5, %v1005_v12 }
 0x3b6   : > { %1554 = vmatmul.msk.f32.gmra.mxu1 %vm850_vm5, %v1006_v14 }
 0x3be   : > { %1555 = vmatmul.msk.f32.gmra.mxu1 %vm850_vm5, %v1007_v15 }
 0x423   : > { %v2311_v17 = vpop.f32.mrf.mxu1 }
 0x424   : > { %v1059_v23 = vmul.f32 %v2311_v17, %v2311_v17 }
 0x42b   : > { %v2313_v18 = vpop.f32.mrf.mxu1 }
 0x42c   : > { %1053 = vadd.xlane.f32.xlu1 %v2313_v18  ;;  %v1060_v24 = vmul.f32 %v2313_v18, %v2313_v18 }
 0x433   : > { %v2316_v19 = vpop.f32.mrf.mxu1 }
 0x434   : > { %1055 = vadd.xlane.f32.xlu2 %v2316_v19  ;;  %v1061_v20 = vmul.f32 %v2316_v19, %v2316_v19 }
 0x43b   : > { %v2321_v21 = vpop.f32.mrf.mxu1 }
 0x43c   : > { %1067 = vadd.xlane.f32.xlu2 %v1061_v20  ;;  %1057 = vadd.xlane.f32.xlu1 %v2321_v21  ;;  %v1062_v22 = vmul.f32 %v2321_v21, %v2321_v21 }
 0x43e   : > { %1069 = vadd.xlane.f32.xlu0 %v1062_v22 }
 0x444   : > { %1063 = vadd.xlane.f32.xlu2 %v1059_v23  ;;  %1065 = vadd.xlane.f32.xlu1 %v1060_v24 }
 0x446   : > { %1051 = vadd.xlane.f32.xlu0 %v2311_v17 }
 0x49f   : > { %v1054_v25 = vpop.xlane.xlu1 %1053 }
 0x4a0   : > { %v2331_v36 = vmul.f32 0.0078125, %v1054_v25 }
 0x4a2   : > { %v1080_v42 = vmul.f32 %v2331_v36, %v2331_v36 }
 0x4a7   : > { %v1056_v26 = vpop.xlane.xlu2 %1055 }
 0x4a8   : > { %v1073_v27 = vmul.f32 0.0078125, %v1056_v26 }
 0x4aa   : > { %v1081_v29 = vmul.f32 %v1073_v27, %v1073_v27  ;;  %v1133_v2 = vsub.f32 %v2316_v19, %v1073_v27 }
 0x4af   : > { %v1068_v13 = vpop.xlane.xlu2 %1067  ;;  %v1058_v28 = vpop.xlane.xlu1 %1057 }
 0x4b0   : > { %v1077_v30 = vmul.f32 0.0078125, %v1068_v13  ;;  %v1074_v31 = vmul.f32 0.0078125, %v1058_v28 }
 0x4b1   : > { %v1070_v32 = vpop.xlane.xlu0 %1069 }
 0x4b2   : > { %v1085_v33 = vsub.f32 %v1077_v30, %v1081_v29  ;;  %v1082_v34 = vmul.f32 %v1074_v31, %v1074_v31  ;;  %v1078_v35 = vmul.f32 0.0078125, %v1070_v32  ;;  %v1134_v6 = vsub.f32 %v2321_v21, %v1074_v31 }
 0x4b3   : > { %v1132_v21 = vsub.f32 %v2313_v18, %v2331_v36 }
 0x4b4   : > { %v1089_v37 = vadd.f32 1e-05, %v1085_v33  ;;  %v1086_v38 = vsub.f32 %v1078_v35, %v1082_v34 }
 0x4b6   : > { %1684 = vrsqrt.f32 %v1089_v37  ;;  %v1090_v39 = vadd.f32 1e-05, %v1086_v38  ;;  %vm1117_vm9 = vweird.f32 %v1089_v37 }
 0x4b7   : > { %v1066_v40 = vpop.xlane.xlu1 %1065  ;;  %v1064_v44 = vpop.xlane.xlu2 %1063 }
 0x4b8   : > { %1686 = vrsqrt.f32 %v1090_v39  ;;  %v1076_v43 = vmul.f32 0.0078125, %v1066_v40  ;;  %v1075_v51 = vmul.f32 0.0078125, %v1064_v44  ;;  %vm1127_vm12 = vweird.f32 %v1090_v39  ;;  %v1162_v44 = vld [vmem:[%s2481_s12 + $0x8] sm:$0xff] }
 0x4b9   : > { %v1052_v9 = vpop.xlane.xlu0 %1051 }
 0x4ba   : > { %v1084_v45 = vsub.f32 %v1076_v43, %v1080_v42  ;;  %v2335_v47 = vmul.f32 0.0078125, %v1052_v9  ;;  %v1163_v9 = vld [vmem:[%s2481_s12 + $0x10] sm:$0xff] }
 0x4bc   : > { %v1685_v48 = vpop.eup %1684  ;;  %v1088_v52 = vadd.f32 1e-05, %v1084_v45  ;;  %v1079_v50 = vmul.f32 %v2335_v47, %v2335_v47  ;;  %v1131_v31 = vsub.f32 %v2311_v17, %v2335_v47  ;;  %v1161_v17 = vld [vmem:[%s2481_s12] sm:$0xff]  ;;  %v1164_v45 = vld [vmem:[%s2481_s12 + $0x18] sm:$0xff] }
 0x4bd   : > { %v1112_v53 = vmul.f32 %v1685_v48, %v1089_v37  ;;  %vm1118_vm8 = vweird.f32 %v1685_v48 }
 0x4be   : > { %v1687_v54 = vpop.eup %1686  ;;  %1688 = vrsqrt.f32 %v1088_v52  ;;  %v1083_v55 = vsub.f32 %v1075_v51, %v1079_v50  ;;  %vm1119_vm11 = vmor %vm1117_vm9, %vm1118_vm8  ;;  %vm1107_vm15 = vweird.f32 %v1088_v52 }
 0x4bf   : > { %v1113_v57 = vmul.f32 %v1685_v48, %v1112_v53  ;;  %v1122_v59 = vmul.f32 %v1687_v54, %v1090_v39  ;;  %vm1128_vm10 = vweird.f32 %v1687_v54 }
 0x4c0   : > { %v1087_v60 = vadd.f32 1e-05, %v1083_v55  ;;  %vm1129_vm13 = vmor %vm1127_vm12, %vm1128_vm10 }
 0x4c1   : > { %v1114_v16 = vmul.f32 0.5, %v1113_v57  ;;  %v1123_v58 = vmul.f32 %v1687_v54, %v1122_v59  ;;  %v1376_v57 = vld [vmem:[%s2483_s14 + $0x8] sm:$0xff]  ;;  %v1377_v59 = vld [vmem:[%s2483_s14 + $0x10] sm:$0xff] }
 0x4c2   : > { %1690 = vrsqrt.f32 %v1087_v60  ;;  %vm1097_vm3 = vweird.f32 %v1087_v60 }
 0x4c3   : > { %v1115_v61 = vsub.f32 1.5, %v1114_v16  ;;  %v1124_v62 = vmul.f32 0.5, %v1123_v58  ;;  %v1378_v16 = vld [vmem:[%s2483_s14 + $0x18] sm:$0xff] }
 0x4c4   : > { %v1689_v63 = vpop.eup %1688 }
 0x4c5   : > { %v1116_v0 = vmul.f32 %v1685_v48, %v1115_v61  ;;  %v1125_v49 = vsub.f32 1.5, %v1124_v62  ;;  %v1102_v1 = vmul.f32 %v1689_v63, %v1088_v52  ;;  %vm1108_vm14 = vweird.f32 %v1689_v63 }
 0x4c6   : > { %vm1109_vm0 = vmor %vm1107_vm15, %vm1108_vm14 }
 0x4c7   : > { %v1126_v46 = vmul.f32 %v1687_v54, %v1125_v49  ;;  %v1103_v3 = vmul.f32 %v1689_v63, %v1102_v1  ;;  %v1120_v4 = vsel %vm1119_vm11, %v1685_v48, %v1116_v0 }
 0x4c8   : > { %v1691_v5 = vpop.eup %1690  ;;  %v1137_v8 = vmul.f32 %v1133_v2, %v1120_v4 }
 0x4c9   : > { %v1104_v10 = vmul.f32 0.5, %v1103_v3  ;;  %v1092_v56 = vmul.f32 %v1691_v5, %v1087_v60  ;;  %v1130_v11 = vsel %vm1129_vm13, %v1687_v54, %v1126_v46  ;;  %vm1098_vm1 = vweird.f32 %v1691_v5  ;;  %v1375_v60 = vld [vmem:[%s2483_s14] sm:$0xff] }
 0x4ca   : > { %v1138_v12 = vmul.f32 %v1134_v6, %v1130_v11  ;;  %v1142_v14 = vmul.f32 %v1664_v41, %v1137_v8  ;;  %vm1099_vm6 = vmor %vm1097_vm3, %vm1098_vm1 }
 0x4cb   : > { %v1105_v15 = vsub.f32 1.5, %v1104_v10  ;;  %v1093_v19 = vmul.f32 %v1691_v5, %v1092_v56 }
 0x4cc   : > { %v1143_v20 = vmul.f32 %v1664_v41, %v1138_v12  ;;  %v1147_v22 = vadd.f32 %v1665_v7, %v1142_v14 }
 0x4cd   : > { %v1106_v23 = vmul.f32 %v1689_v63, %v1105_v15  ;;  %v1094_v24 = vmul.f32 0.5, %v1093_v19 }
 0x4ce   : > { %v1148_v25 = vadd.f32 %v1665_v7, %v1143_v20  ;;  %v1155_v28 = vmul.f32 0.01, %v1147_v22  ;;  %vm1151_vm4 = vcmp.ge.f32.partialorder %v1147_v22, 0.0 }
 0x4cf   : > { %v1095_v26 = vsub.f32 1.5, %v1094_v24  ;;  %v1110_v27 = vsel %vm1109_vm0, %v1689_v63, %v1106_v23 }
 0x4d0   : > { %vm1152_vm2 = vcmp.ge.f32.partialorder %v1148_v25, 0.0  ;;  %v1156_v13 = vmul.f32 0.01, %v1148_v25  ;;  %v1136_v29 = vmul.f32 %v1132_v21, %v1110_v27  ;;  %v1159_v35 = vsel %vm1151_vm4, %v1147_v22, %v1155_v28 }
 0x4d1   : > { %v1096_v30 = vmul.f32 %v1691_v5, %v1095_v26 }
 0x4d2   : > { %v1160_v32 = vsel %vm1152_vm2, %v1148_v25, %v1156_v13  ;;  %v1141_v33 = vmul.f32 %v1664_v41, %v1136_v29 }
 0x4d3   : > { %v1100_v34 = vsel %vm1099_vm6, %v1691_v5, %v1096_v30  ;;  %1189 = vmatpush.msra.mxu2 %v1160_v32 }
 0x4d4   : > { %v1135_v18 = vmul.f32 %v1131_v31, %v1100_v34  ;;  %v1146_v36 = vadd.f32 %v1665_v7, %v1141_v33 }
 0x4d5   : > { %1190 = vmatpush.msra.mxu2 %v1159_v35 }
 0x4d6   : > { %v1140_v37 = vmul.f32 %v1664_v41, %v1135_v18  ;;  %vm1150_vm7 = vcmp.ge.f32.partialorder %v1146_v36, 0.0  ;;  %v1154_v38 = vmul.f32 0.01, %v1146_v36 }
 0x4d8   : > { %v1158_v39 = vsel %vm1150_vm7, %v1146_v36, %v1154_v38  ;;  %v1145_v40 = vadd.f32 %v1665_v7, %v1140_v37  ;;  %v1666_v37 = vld [vmem:[%s2484_s15 + $0x6] ss:$0 sm:$0xff] }
 0x4d9   : > { %1191 = vmatpush.msra.mxu2 %v1158_v39 }
 0x4da   : > { %vm1149_vm8 = vcmp.ge.f32.partialorder %v1145_v40, 0.0  ;;  %v1153_v42 = vmul.f32 0.01, %v1145_v40 }
 0x4dc   : > { %v1157_v43 = vsel %vm1149_vm8, %v1145_v40, %v1153_v42 }
 0x4dd   : > { %1192 = vmatpush.msra.mxu2 %v1157_v43  ;;  %v1667_v43 = vld [vmem:[%s2484_s15 + $0x7] ss:$0 sm:$0xff] }
 0x4de   : > { %1556 = vmatmul.msk.f32.vlgmr.msra.gmra.mxu2 %vm850_vm5, %v1161_v17 }
 0x4e6   : > { %1557 = vmatmul.msk.f32.gmra.mxu2 %vm850_vm5, %v1162_v44 }
 0x4ee   : > { %1558 = vmatmul.msk.f32.gmra.mxu2 %vm850_vm5, %v1163_v9 }
 0x4f6   : > { %1559 = vmatmul.msk.f32.gmra.mxu2 %vm850_vm5, %v1164_v45 }
 0x561   : > { %v2367_v47 = vpop.f32.mrf.mxu2 }
 0x562   : > { %v1216_v54 = vmul.f32 %v2367_v47, %v2367_v47 }
 0x569   : > { %v2369_v48 = vpop.f32.mrf.mxu2 }
 0x56a   : > { %1210 = vadd.xlane.f32.xlu0 %v2369_v48  ;;  %v1217_v55 = vmul.f32 %v2369_v48, %v2369_v48 }
 0x571   : > { %v2372_v51 = vpop.f32.mrf.mxu2 }
 0x572   : > { %1212 = vadd.xlane.f32.xlu1 %v2372_v51  ;;  %v1218_v52 = vmul.f32 %v2372_v51, %v2372_v51 }
 0x579   : > { %v2377_v50 = vpop.f32.mrf.mxu2 }
 0x57a   : > { %1224 = vadd.xlane.f32.xlu1 %v1218_v52  ;;  %1214 = vadd.xlane.f32.xlu0 %v2377_v50  ;;  %v1219_v53 = vmul.f32 %v2377_v50, %v2377_v50 }
 0x57c   : > { %1226 = vadd.xlane.f32.xlu2 %v1219_v53 }
 0x582   : > { %1220 = vadd.xlane.f32.xlu1 %v1216_v54  ;;  %1222 = vadd.xlane.f32.xlu0 %v1217_v55 }
 0x584   : > { %1208 = vadd.xlane.f32.xlu2 %v2367_v47 }
 0x596   : > { %1386 = vperm.xlu0 %1656, %v1376_v57  }
 0x59b   : > { %1391 = vperm.xlu1 %1657, %v1377_v59  }
 0x59c   : > { %1381 = vperm.xlu2 %1658, %v1375_v60  }
 0x59e   : > { %1396 = vperm.xlu0 %1656, %v1378_v16  }
 0x5dd   : > { %v1211_v58 = vpop.xlane.xlu0 %1210 }
 0x5de   : > { %v2399_v5 = vmul.f32 0.0078125, %v1211_v58 }
 0x5e0   : > { %v1237_v56 = vmul.f32 %v2399_v5, %v2399_v5 }
 0x5e5   : > { %v1213_v61 = vpop.xlane.xlu1 %1212 }
 0x5e6   : > { %v1230_v62 = vmul.f32 0.0078125, %v1213_v61 }
 0x5e8   : > { %v1238_v49 = vmul.f32 %v1230_v62, %v1230_v62  ;;  %v1290_v36 = vsub.f32 %v2372_v51, %v1230_v62 }
 0x5ed   : > { %v1225_v63 = vpop.xlane.xlu1 %1224  ;;  %v1215_v0 = vpop.xlane.xlu0 %1214 }
 0x5ee   : > { %v1234_v1 = vmul.f32 0.0078125, %v1225_v63  ;;  %v1231_v2 = vmul.f32 0.0078125, %v1215_v0 }
 0x5ef   : > { %v1227_v41 = vpop.xlane.xlu2 %1226 }
 0x5f0   : > { %v1242_v46 = vsub.f32 %v1234_v1, %v1238_v49  ;;  %v1239_v3 = vmul.f32 %v1231_v2, %v1231_v2  ;;  %v1235_v4 = vmul.f32 0.0078125, %v1227_v41  ;;  %v1291_v17 = vsub.f32 %v2377_v50, %v1231_v2 }
 0x5f1   : > { %v1289_v50 = vsub.f32 %v2369_v48, %v2399_v5 }
 0x5f2   : > { %v1246_v6 = vadd.f32 1e-05, %v1242_v46  ;;  %v1243_v7 = vsub.f32 %v1235_v4, %v1239_v3 }
 0x5f4   : > { %1692 = vrsqrt.f32 %v1246_v6  ;;  %v1247_v8 = vadd.f32 1e-05, %v1243_v7  ;;  %vm1274_vm10 = vweird.f32 %v1246_v6 }
 0x5f5   : > { %v1223_v10 = vpop.xlane.xlu0 %1222  ;;  %v1221_v12 = vpop.xlane.xlu1 %1220 }
 0x5f6   : > { %1694 = vrsqrt.f32 %v1247_v8  ;;  %v1233_v11 = vmul.f32 0.0078125, %v1223_v10  ;;  %v1232_v22 = vmul.f32 0.0078125, %v1221_v12  ;;  %vm1284_vm13 = vweird.f32 %v1247_v8  ;;  %v1319_v12 = vld [vmem:[%s2514_s0 + $0x8] sm:$0xff] }
 0x5f7   : > { %v1209_v14 = vpop.xlane.xlu2 %1208 }
 0x5f8   : > { %v1241_v15 = vsub.f32 %v1233_v11, %v1237_v56  ;;  %v2403_v19 = vmul.f32 0.0078125, %v1209_v14  ;;  %v1320_v14 = vld [vmem:[%s2514_s0 + $0x10] sm:$0xff] }
 0x5fa   : > { %v1693_v20 = vpop.eup %1692  ;;  %v1245_v23 = vadd.f32 1e-05, %v1241_v15  ;;  %v1236_v24 = vmul.f32 %v2403_v19, %v2403_v19  ;;  %v1288_v2 = vsub.f32 %v2367_v47, %v2403_v19  ;;  %v1318_v47 = vld [vmem:[%s2514_s0] sm:$0xff]  ;;  %v1321_v15 = vld [vmem:[%s2514_s0 + $0x18] sm:$0xff] }
 0x5fb   : > { %v1269_v21 = vmul.f32 %v1693_v20, %v1246_v6  ;;  %vm1275_vm9 = vweird.f32 %v1693_v20 }
 0x5fc   : > { %v1695_v25 = vpop.eup %1694  ;;  %1696 = vrsqrt.f32 %v1245_v23  ;;  %v1240_v26 = vsub.f32 %v1232_v22, %v1236_v24  ;;  %vm1276_vm12 = vmor %vm1274_vm10, %vm1275_vm9  ;;  %vm1264_vm0 = vweird.f32 %v1245_v23 }
 0x5fd   : > { %v1270_v27 = vmul.f32 %v1693_v20, %v1269_v21  ;;  %v1279_v13 = vmul.f32 %v1695_v25, %v1247_v8  ;;  %vm1285_vm11 = vweird.f32 %v1695_v25 }
 0x5fe   : > { %v1244_v28 = vadd.f32 1e-05, %v1240_v26  ;;  %vm1286_vm14 = vmor %vm1284_vm13, %vm1285_vm11 }
 0x5ff   : > { %v1271_v29 = vmul.f32 0.5, %v1270_v27  ;;  %v1280_v30 = vmul.f32 %v1695_v25, %v1279_v13 }
 0x600   : > { %1698 = vrsqrt.f32 %v1244_v28  ;;  %vm1254_vm4 = vweird.f32 %v1244_v28 }
 0x601   : > { %v1272_v31 = vsub.f32 1.5, %v1271_v29  ;;  %v1281_v32 = vmul.f32 0.5, %v1280_v30  ;;  %v1382_v29 = vpop.permute.xlu2 %1381 }
 0x602   : > { %v1697_v33 = vpop.eup %1696 }
 0x603   : > { %v1273_v34 = vmul.f32 %v1693_v20, %v1272_v31  ;;  %v1282_v18 = vsub.f32 1.5, %v1281_v32  ;;  %v1259_v35 = vmul.f32 %v1697_v33, %v1245_v23  ;;  %vm1265_vm15 = vweird.f32 %v1697_v33 }
 0x604   : > { %vm1266_vm1 = vmor %vm1264_vm0, %vm1265_vm15 }
 0x605   : > { %v1283_v38 = vmul.f32 %v1695_v25, %v1282_v18  ;;  %v1260_v39 = vmul.f32 %v1697_v33, %v1259_v35  ;;  %v1277_v40 = vsel %vm1276_vm12, %v1693_v20, %v1273_v34 }
 0x606   : > { %v1699_v42 = vpop.eup %1698  ;;  %v1294_v44 = vmul.f32 %v1290_v36, %v1277_v40 }
 0x607   : > { %v1261_v9 = vmul.f32 0.5, %v1260_v39  ;;  %v1249_v45 = vmul.f32 %v1699_v42, %v1244_v28  ;;  %v1287_v51 = vsel %vm1286_vm14, %v1695_v25, %v1283_v38  ;;  %vm1255_vm2 = vweird.f32 %v1699_v42 }
 0x608   : > { %v1295_v52 = vmul.f32 %v1291_v17, %v1287_v51  ;;  %v1299_v53 = vmul.f32 %v1666_v37, %v1294_v44  ;;  %vm1256_vm7 = vmor %vm1254_vm4, %vm1255_vm2  ;;  %v1387_v24 = vpop.permute.xlu0 %1386 }
 0x609   : > { %v1262_v54 = vsub.f32 1.5, %v1261_v9  ;;  %v1250_v55 = vmul.f32 %v1699_v42, %v1249_v45 }
 0x60a   : > { %v1300_v57 = vmul.f32 %v1666_v37, %v1295_v52  ;;  %v1304_v59 = vadd.f32 %v1667_v43, %v1299_v53 }
 0x60b   : > { %v1263_v60 = vmul.f32 %v1697_v33, %v1262_v54  ;;  %v1251_v16 = vmul.f32 0.5, %v1250_v55 }
 0x60c   : > { %v1305_v58 = vadd.f32 %v1667_v43, %v1300_v57  ;;  %v1312_v0 = vmul.f32 0.01, %v1304_v59  ;;  %vm1308_vm6 = vcmp.ge.f32.partialorder %v1304_v59, 0.0 }
 0x60d   : > { %v1252_v61 = vsub.f32 1.5, %v1251_v16  ;;  %v1267_v62 = vsel %vm1266_vm1, %v1697_v33, %v1263_v60  ;;  %v1392_v30 = vpop.permute.xlu1 %1391 }
 0x60e   : > { %vm1309_vm3 = vcmp.ge.f32.partialorder %v1305_v58, 0.0  ;;  %v1313_v63 = vmul.f32 0.01, %v1305_v58  ;;  %v1293_v49 = vmul.f32 %v1289_v50, %v1267_v62  ;;  %v1316_v4 = vsel %vm1308_vm6, %v1304_v59, %v1312_v0 }
 0x60f   : > { %v1253_v1 = vmul.f32 %v1699_v42, %v1252_v61 }
 0x610   : > { %v1317_v41 = vsel %vm1309_vm3, %v1305_v58, %v1313_v63  ;;  %v1298_v46 = vmul.f32 %v1666_v37, %v1293_v49  ;;  %v1397_v35 = vpop.permute.xlu0 %1396 }
 0x611   : > { %v1257_v3 = vsel %vm1256_vm7, %v1699_v42, %v1253_v1  ;;  %1346 = vmatpush.msra.mxu3 %v1317_v41 }
 0x612   : > { %v1292_v48 = vmul.f32 %v1288_v2, %v1257_v3  ;;  %v1303_v5 = vadd.f32 %v1667_v43, %v1298_v46 }
 0x613   : > { %1347 = vmatpush.msra.mxu3 %v1316_v4 }
 0x614   : > { %v1297_v6 = vmul.f32 %v1666_v37, %v1292_v48  ;;  %vm1307_vm8 = vcmp.ge.f32.partialorder %v1303_v5, 0.0  ;;  %v1311_v7 = vmul.f32 0.01, %v1303_v5 }
 0x616   : > { %v1315_v8 = vsel %vm1307_vm8, %v1303_v5, %v1311_v7  ;;  %v1302_v10 = vadd.f32 %v1667_v43, %v1297_v6 }
 0x617   : > { %1348 = vmatpush.msra.mxu3 %v1315_v8 }
 0x618   : > { %vm1306_vm9 = vcmp.ge.f32.partialorder %v1302_v10, 0.0  ;;  %v1310_v56 = vmul.f32 0.01, %v1302_v10 }
 0x61a   : > { %v1314_v11 = vsel %vm1306_vm9, %v1302_v10, %v1310_v56 }
 0x61b   : > { %1349 = vmatpush.msra.mxu3 %v1314_v11 }
 0x61c   : > { %1560 = vmatmul.msk.f32.vlgmr.msra.gmra.mxu3 %vm850_vm5, %v1318_v47 }
 0x624   : > { %1561 = vmatmul.msk.f32.gmra.mxu3 %vm850_vm5, %v1319_v12 }
 0x62c   : > { %1562 = vmatmul.msk.f32.gmra.mxu3 %vm850_vm5, %v1320_v14 }
 0x634   : > { %1563 = vmatmul.msk.f32.gmra.mxu3 %vm850_vm5, %v1321_v15 }
 0x69f   : > { %v1351_v19 = vpop.f32.mrf.mxu3 }
 0x6a0   : > { %v1367_v21 = vmul.f32 0.01, %v1351_v19  ;;  %vm1363_vm11 = vcmp.ge.f32.partialorder %v1351_v19, 0.0 }
 0x6a2   : > { %v1371_v27 = vsel %vm1363_vm11, %v1351_v19, %v1367_v21 }
 0x6a3   : > { %v1399_v31 = vmul.f32 %v1382_v29, %v1371_v27 }
 0x6a7   : > { %v1354_v20 = vpop.f32.mrf.mxu3 }
 0x6a8   : > { %v1368_v22 = vmul.f32 0.01, %v1354_v20  ;;  %vm1364_vm10 = vcmp.ge.f32.partialorder %v1354_v20, 0.0 }
 0x6aa   : > { %v1372_v26 = vsel %vm1364_vm10, %v1354_v20, %v1368_v22 }
 0x6ab   : > { %v1400_v28 = vmul.f32 %v1387_v24, %v1372_v26 }
 0x6ad   : > { %v1403_v18 = vadd.f32 %v1400_v28, %v1399_v31 }
 0x6af   : > { %v1357_v23 = vpop.f32.mrf.mxu3 }
 0x6b0   : > { %v1369_v25 = vmul.f32 0.01, %v1357_v23  ;;  %vm1365_vm12 = vcmp.ge.f32.partialorder %v1357_v23, 0.0 }
 0x6b2   : > { %v1373_v13 = vsel %vm1365_vm12, %v1357_v23, %v1369_v25 }
 0x6b3   : > { %v1401_v32 = vmul.f32 %v1392_v30, %v1373_v13 }
 0x6b5   : > { %v1404_v37 = vadd.f32 %v1403_v18, %v1401_v32 }
 0x6b7   : > { %v1360_v33 = vpop.f32.mrf.mxu3 }
 0x6b8   : > { %vm1366_vm5 = vcmp.ge.f32.partialorder %v1360_v33, 0.0  ;;  %v1370_v34 = vmul.f32 0.01, %v1360_v33 }
 0x6ba   : > { %v1374_v36 = vsel %vm1366_vm5, %v1360_v33, %v1370_v34 }
 0x6bb   : > { %v1402_v38 = vmul.f32 %v1397_v35, %v1374_v36 }
 0x6bd   : > { %v1405_v39 = vadd.f32 %v1404_v37, %v1402_v38 }
 0x6bf   : > { %v1406_v40 = vrot.slane %v1405_v39, 4 }
 0x6c1   : > { %v1407_v42 = vadd.f32 %v1406_v40, %v1405_v39 }
 0x6c3   : > { %v1408_v17 = vrot.slane %v1407_v42, 2 }
 0x6c5   : > { %v1409_v43 = vadd.f32 %v1408_v17, %v1407_v42 }
 0x6c7   : > { %v1410_v44 = vrot.slane %v1409_v43, 1 }
 0x6c9   : > { %v1411_v9 = vadd.f32 %v1410_v44, %v1409_v43 }
 0x6cb   : > { %v1412_v45 = vmax.f32 %v1411_v9, 0.0 }
 0x6cd   : > { %1413 = vst [vmem:[%s606_s27] sm:$0x1] %v1412_v45 }
 0x6ce   : > { %1877 = shalt.err (!%p1874_p10)
}
 0x6cf   : > { %1584 = dma.vmem_to_hbm [thread:$0]  (%p2105_p5), %s1426_s16, 16, %s1428_s2, %s1415_s3  }
 0x6d0 PF: > { %s1439_s20 = sand.u32 1, %s1912_s21   ;;  %p2516_p13 = scmp.ge.s32.totalorder %s1924_s24, 2 }
 0x6d1   : > { %s1440_s25 = scalar_lea.sflag [#allocation4], %s1439_s20 }
 0x6d2   : > { %p1604_p11 = pnand %p2516_p13, %p2109_p6 }
 0x6d4   : > { %p1605_p0 = pneg %p1604_p11 }
 0x6d6   : > { %1907 = dma.done.wait (%p1605_p0), %s1440_s25, 16  }
 0x6d7   : > { %1909 = vsyncadd (%p1605_p0), %s1440_s25, 4294967280  ;;  %s2517_s24 = sld [smem:[#allocation17_spill]]  ;;  %s2520_s21 = smov %s1916_s22 }
 0x6d8   : > { %s2518_s27 = sld [smem:[#allocation16_spill]] }
 0x6d9   : > { %s2519_s23 = sld [smem:[#allocation18_spill]] }
 0x6dd   : > { %p31_p2 = scmp.ge.s32.totalorder %s2517_s24, 4  }
 0x6de   : > { %s2521_s22 = smov %s2518_s27 }
 0x6df   :  { %33 = sbr.rel (!%p31_p2) target bundleno = 15 (0xf), region = 148 }
 0x6e4   :  { %1445 = vsyncpa [#allocation3], 1 }
 0x6e5   :  { %1447 = vsyncpa [#allocation3 + $0x1], 1 }
 0x6e6   :  { %1448 = vsyncpa [#allocation6], 1 }
 0x6e7   :  { %1449 = vsyncpa [#allocation9], 1 }
 0x6e8   :  { %1450 = vsyncpa [#allocation4], 1 }
 0x6e9   :  { %1452 = vsyncpa [#allocation4 + $0x1], 1 }

</bundles_post_ra>
